<compile_context>
chip_gen: v5e
topology: v5e:2x2
jax: 0.10.0
libtpu: 0.0.40
codegen_flags: <defaults>
</compile_context>

<pallas_src>
import functools

import jax
import jax.numpy as jnp
from jax import lax
from jax.experimental import pallas as pl
from jax.experimental.pallas import tpu as pltpu


def _round_up(x, m):
    return (x + m - 1) // m * m


# ----------------------------------------------------------------------------
# Fused backbone + head kernel
#   (patchify-conv as matmul -> ReLU -> 1x1 conv -> sigmoid on heatmap chans)
# ----------------------------------------------------------------------------
def _backbone_head_kernel(p_ref, wb_ref, bb_ref, wh_ref, bh_ref, o_ref,
                          *, num_classes):
    # p_ref: [TILE_M, Kp_pad] bf16 ; wb: [Kp_pad, Cb_pad] bf16 ; bb: [1, Cb_pad] f32
    # wh:    [Cb_pad, Cout_pad] bf16 ; bh: [1, Cout_pad] f32
    feat = jnp.dot(p_ref[...], wb_ref[...],
                   preferred_element_type=jnp.float32)          # MXU bf16, f32 acc
    feat = jnp.maximum(feat + bb_ref[...], 0.0)                 # ReLU (backbone)
    out = jnp.dot(feat.astype(wh_ref.dtype), wh_ref[...],
                  preferred_element_type=jnp.float32)
    out = out + bh_ref[...]
    # Sigmoid only on the first `num_classes` (heatmap) channels.  Cout is lane
    # padded to 128, so a sub-128 lane slice+concat would force a vreg relayout
    # while the EUP still works on full 128-lane vregs; the mask-select form is
    # therefore kept (padded channels are bias-0 and stay 0).
    ch = lax.broadcasted_iota(jnp.int32, out.shape, dimension=1)
    out = jnp.where(ch < num_classes, jax.nn.sigmoid(out), out)
    o_ref[...] = out.astype(o_ref.dtype)


def backbone_head(x_nchw, params, *, num_classes, stride=4, tile_m=512):
    """x_nchw: [B, Cin, H, W] -> points [B, num_classes+4, H//stride, W//stride]."""
    wb, bb, wh, bh = params                     # already lane-padded, bf16/f32
    B, Cin, H, W = x_nchw.shape
    Hf, Wf = H // stride, W // stride
    Kp = stride * stride * Cin
    Kp_pad, Cb_pad = wb.shape
    Cout_pad = wh.shape[1]
    Cout = num_classes + 4

    # Glue: patchify (im2col for a stride-4, kernel-4 conv), bf16 to halve the
    # HBM traffic of the dominant activation tensor.
    # TODO(synk): fold this im2col + pad into the kernel pipeline (BlockSpec
    # over (Hf, Wf) tiles of x) to remove the HBM round trip of `patches`.
    x_nhwc = jnp.transpose(x_nchw.astype(jnp.bfloat16), (0, 2, 3, 1))
    patches = x_nhwc.reshape(B, Hf, stride, Wf, stride, Cin)
    patches = jnp.transpose(patches, (0, 1, 3, 2, 4, 5))
    patches = patches.reshape(B * Hf * Wf, Kp)                  # [M, Kp]

    M = patches.shape[0]
    tile_m = min(tile_m, _round_up(M, 8))
    M_pad = _round_up(M, tile_m)
    patches = jnp.pad(patches, ((0, M_pad - M), (0, Kp_pad - Kp)))

    out = pl.pallas_call(
        functools.partial(_backbone_head_kernel, num_classes=num_classes),
        out_shape=jax.ShapeDtypeStruct((M_pad, Cout_pad), jnp.float32),
        grid=(M_pad // tile_m,),                                # tiled over tokens
        in_specs=[
            pl.BlockSpec((tile_m, Kp_pad), lambda i: (i, 0)),   # streamed
            pl.BlockSpec((Kp_pad, Cb_pad), lambda i: (0, 0)),   # VMEM-resident
            pl.BlockSpec((1, Cb_pad), lambda i: (0, 0)),
            pl.BlockSpec((Cb_pad, Cout_pad), lambda i: (0, 0)),
            pl.BlockSpec((1, Cout_pad), lambda i: (0, 0)),
        ],
        out_specs=pl.BlockSpec((tile_m, Cout_pad), lambda i: (i, 0)),
        compiler_params=pltpu.CompilerParams(
            dimension_semantics=("parallel",),                  # shards across TCs (v7x)
            vmem_limit_bytes=32 * 1024 * 1024),                 # safe on v5e/v6e/v7x
    )(patches, wb, bb, wh, bh)

    points = out[:M, :Cout].reshape(B, Hf, Wf, Cout)
    # NCHW at the API boundary (matches PyTorch).  NMS also consumes NCHW so
    # that W stays on lanes for the roll-based maxpool.
    return jnp.transpose(points, (0, 3, 1, 2))


def backbone_head_ref(x_nchw, params, *, num_classes, stride=4):
    """Plain-XLA reference for the synthetic backbone+head (same padded params)."""
    wb, bb, wh, bh = params
    B, Cin, H, W = x_nchw.shape
    Hf, Wf = H // stride, W // stride
    Kp = stride * stride * Cin
    Cout = num_classes + 4
    x = jnp.transpose(x_nchw.astype(jnp.bfloat16), (0, 2, 3, 1))
    p = x.reshape(B, Hf, stride, Wf, stride, Cin)
    p = jnp.transpose(p, (0, 1, 3, 2, 4, 5)).reshape(B * Hf * Wf, Kp)
    p = jnp.pad(p, ((0, 0), (0, wb.shape[0] - Kp)))
    feat = jnp.maximum(jnp.dot(p, wb, preferred_element_type=jnp.float32) + bb, 0.0)
    out = jnp.dot(feat.astype(jnp.bfloat16), wh,
                  preferred_element_type=jnp.float32) + bh
    out = out.at[:, :num_classes].set(jax.nn.sigmoid(out[:, :num_classes]))
    out = out[:, :Cout].reshape(B, Hf, Wf, Cout)
    return jnp.transpose(out, (0, 3, 1, 2))


# ----------------------------------------------------------------------------
# PointsNonMaxSuppression kernel (exact semantics of the PyTorch module):
#   heat = points[:, :-4].max(1, keepdim)
#   hmax = max_pool2d(heat, k, stride=1, padding=(k-1)//2)   (-inf padding)
#   keep = (hmax == heat).float()
#   return points * keep
# ----------------------------------------------------------------------------
def _nms_kernel(pts_ref, out_ref, *, kernel_size, num_regression=4):
    pts = pts_ref[...]                                  # [Bt, C, H, W] f32
    Bt, C, H, W = pts.shape
    pad = (kernel_size - 1) // 2
    heat = jnp.max(pts[:, :C - num_regression], axis=1)  # [Bt, H, W] (f32, exact)

    h_idx = lax.broadcasted_iota(jnp.int32, (H, W), dimension=0)
    w_idx = lax.broadcasted_iota(jnp.int32, (H, W), dimension=1)

    # Precompute (shift, validity-mask) pairs once per grid step.  The iota is
    # rolled with the same call as the data, so the mask is derived from the
    # actual source offset (robust to roll direction) and -inf-masks both the
    # image border and any cyclic wraparound.
    def masks_for(idx, axis):
        n = idx.shape[axis]
        res = []
        for s in range(1, pad + 1):
            for sgn in (-1, 1):
                shift = (sgn * s) % n                    # non-negative static shift
                ridx = pltpu.roll(idx, shift=shift, axis=axis)
                res.append((shift, jnp.abs(ridx - idx) <= pad))
        return res

    w_masks = masks_for(w_idx, axis=1)                   # lane (W) rolls -> XLU
    h_masks = masks_for(h_idx, axis=0)                   # sublane (H) rolls -> XLU

    def window_max(x, axis, masks):
        out = x
        for shift, valid in masks:
            rolled = pltpu.roll(x, shift=shift, axis=axis)
            out = jnp.maximum(out, jnp.where(valid, rolled, -jnp.inf))
        return out

    for b in range(Bt):                                  # static unroll over batch block
        hb = heat[b]                                     # [H, W]
        hmax = window_max(hb, 1, w_masks)                # separable k x k max
        hmax = window_max(hmax, 0, h_masks)
        keep = (hmax == hb).astype(pts.dtype)            # f32 equality, as in PyTorch
        out_ref[b] = pts[b] * keep[None, :, :]


def points_nms(points, kernel_size=3, max_batch_block=8):
    """points: [B, C, H, W] with C = num_classes + 4."""
    B, C, H, W = points.shape
    assert H >= kernel_size and W >= kernel_size, "feature map smaller than NMS window"
    # Block several batch images per grid step to amortize per-step overhead.
    bt = 1
    for d in range(1, min(B, max_batch_block) + 1):
        if B % d == 0:
            bt = d
    return pl.pallas_call(
        functools.partial(_nms_kernel, kernel_size=kernel_size),
        out_shape=jax.ShapeDtypeStruct((B, C, H, W), points.dtype),
        grid=(B // bt,),
        in_specs=[pl.BlockSpec((bt, C, H, W), lambda i: (i, 0, 0, 0))],
        out_specs=pl.BlockSpec((bt, C, H, W), lambda i: (i, 0, 0, 0)),
        compiler_params=pltpu.CompilerParams(dimension_semantics=("parallel",)),
    )(points)


def points_nms_ref(points, kernel_size=3):
    """Plain-XLA reference (reduce_window == PyTorch max_pool2d semantics)."""
    pad = (kernel_size - 1) // 2
    heat = jnp.max(points[:, :-4], axis=1, keepdims=True)
    hmax = lax.reduce_window(
        heat, jnp.array(-jnp.inf, points.dtype), lax.max,
        (1, 1, kernel_size, kernel_size), (1, 1, 1, 1),
        [(0, 0), (0, 0), (pad, pad), (pad, pad)])
    keep = (hmax == heat).astype(points.dtype)
    return points * keep


# ----------------------------------------------------------------------------
# CenterNet forward
# ----------------------------------------------------------------------------
def init_params(cin=3, cb=32, num_classes=2, stride=4):
    kp = stride * stride * cin
    cout = num_classes + 4
    kp_pad, cb_pad, cout_pad = _round_up(kp, 128), _round_up(cb, 128), _round_up(cout, 128)
    k0, k1 = jax.random.split(jax.random.PRNGKey(42))
    wb = jnp.zeros((kp_pad, cb_pad), jnp.float32).at[:kp, :cb].set(
        jax.random.normal(k0, (kp, cb), jnp.float32) * 0.05).astype(jnp.bfloat16)
    bb = jnp.zeros((1, cb_pad), jnp.float32)
    wh = jnp.zeros((cb_pad, cout_pad), jnp.float32).at[:cb, :cout].set(
        jax.random.normal(k1, (cb, cout), jnp.float32) * 0.05).astype(jnp.bfloat16)
    bh = jnp.zeros((1, cout_pad), jnp.float32)
    return (wb, bb, wh, bh)


@functools.partial(jax.jit,
                   static_argnames=("num_classes", "nms_kernel_size", "return_objects"))
def centernet_forward(input_t, params, *, num_classes=2, nms_kernel_size=3,
                      return_objects=False):
    x = backbone_head(input_t, params, num_classes=num_classes)   # backbone + head
    if return_objects:
        x = points_nms(x, kernel_size=nms_kernel_size)            # PointsNonMaxSuppression
        # TODO(synk): PointsToObjects (top-k decode to [B, N, 6]) source was not
        # provided, so the subsequent ScaleObjects (objects[:, :, :4] *= 4) step
        # cannot be chained; returning NMS-filtered points instead.
    return x


if __name__ == "__main__":
    key = jax.random.PRNGKey(0)
    # 32x512 input -> 8x128 feature map: W=128 on lanes / H=8 on sublanes, so
    # the head output stores are lane-dense and the NMS rolls are native-tile.
    x = jax.random.normal(key, (2, 3, 32, 512), jnp.float32)      # NCHW, like PyTorch

    params = init_params(cin=3, cb=32, num_classes=2, stride=4)

    points = centernet_forward(x, params, return_objects=False)   # [2, 6, 8, 128]
    filtered = centernet_forward(x, params, return_objects=True)  # NMS-filtered
    jax.block_until_ready((points, filtered))

    assert points.shape == (2, 6, 8, 128)
    assert filtered.shape == (2, 6, 8, 128)

    # Backbone+head numerics vs plain-XLA reference (same padded bf16 params).
    ref_pts = backbone_head_ref(x, params, num_classes=2)
    assert bool(jnp.allclose(points, ref_pts, atol=1e-2, rtol=1e-2))

    # NMS must exactly match max_pool2d semantics (exact f32 max -> same ties).
    ref_filt = points_nms_ref(points, kernel_size=3)
    assert bool(jnp.all(points_nms(points, kernel_size=3) == ref_filt))

    # NMS must only zero-out points, never change surviving values.
    assert bool(jnp.all((filtered == points) | (filtered == 0.0)))

    print("KERNEL_OK")
</pallas_src>

<mosaic_0001>
module attributes {stable_mosaic.version = 11 : i64} {
  func.func @_backbone_head_kernel(%arg0: i32, %arg1: memref<512x128xbf16, #tpu.memory_space<vmem>>, %arg2: memref<128x128xbf16, #tpu.memory_space<vmem>>, %arg3: memref<1x128xf32, #tpu.memory_space<vmem>>, %arg4: memref<128x128xbf16, #tpu.memory_space<vmem>>, %arg5: memref<1x128xf32, #tpu.memory_space<vmem>>, %arg6: memref<512x128xf32, #tpu.memory_space<vmem>>) attributes {dimension_semantics = [#tpu.dimension_semantics<parallel>], iteration_bounds = array<i64: 4>, scalar_prefetch = 0 : i64, scratch_operands = 0 : i64, tpu.core_type = #tpu.core_type<tc>, window_params = [{transform_indices = @transform_0, window_bounds = array<i64: 512, 128>}, {pipeline_mode = #tpu.pipeline_mode<synchronous>, transform_indices = @transform_1, window_bounds = array<i64: 128, 128>}, {pipeline_mode = #tpu.pipeline_mode<synchronous>, transform_indices = @transform_2, window_bounds = array<i64: 1, 128>}, {pipeline_mode = #tpu.pipeline_mode<synchronous>, transform_indices = @transform_3, window_bounds = array<i64: 128, 128>}, {pipeline_mode = #tpu.pipeline_mode<synchronous>, transform_indices = @transform_4, window_bounds = array<i64: 1, 128>}, {transform_indices = @transform_5, window_bounds = array<i64: 512, 128>}]} {
    %c0 = arith.constant 0 : index
    %c0_0 = arith.constant 0 : index
    %0 = vector.load %arg1[%c0, %c0_0] : memref<512x128xbf16, #tpu.memory_space<vmem>>, vector<512x128xbf16>
    %c0_1 = arith.constant 0 : index
    %c0_2 = arith.constant 0 : index
    %1 = vector.load %arg2[%c0_1, %c0_2] : memref<128x128xbf16, #tpu.memory_space<vmem>>, vector<128x128xbf16>
    %cst = arith.constant dense<0.000000e+00> : vector<512x128xf32>
    %2 = tpu.matmul %0, %1, %cst {dimension_numbers = #tpu.dot_dimension_numbers<[1], [0], [0], [1], [0, 0, 1, 1], [], []>} : vector<512x128xbf16>, vector<128x128xbf16>, vector<512x128xf32> -> vector<512x128xf32>
    %c0_3 = arith.constant 0 : index
    %c0_4 = arith.constant 0 : index
    %3 = vector.load %arg3[%c0_3, %c0_4] : memref<1x128xf32, #tpu.memory_space<vmem>>, vector<1x128xf32>
    %4 = vector.broadcast %3 : vector<1x128xf32> to vector<512x128xf32>
    %5 = arith.addf %2, %4 : vector<512x128xf32>
    %cst_5 = arith.constant 0.000000e+00 : f32
    %6 = vector.broadcast %cst_5 : f32 to vector<512x128xf32>
    %7 = arith.maximumf %5, %6 : vector<512x128xf32>
    %8 = arith.truncf %7 : vector<512x128xf32> to vector<512x128xbf16>
    %c0_6 = arith.constant 0 : index
    %c0_7 = arith.constant 0 : index
    %9 = vector.load %arg4[%c0_6, %c0_7] : memref<128x128xbf16, #tpu.memory_space<vmem>>, vector<128x128xbf16>
    %cst_8 = arith.constant dense<0.000000e+00> : vector<512x128xf32>
    %10 = tpu.matmul %8, %9, %cst_8 {dimension_numbers = #tpu.dot_dimension_numbers<[1], [0], [0], [1], [0, 0, 1, 1], [], []>} : vector<512x128xbf16>, vector<128x128xbf16>, vector<512x128xf32> -> vector<512x128xf32>
    %c0_9 = arith.constant 0 : index
    %c0_10 = arith.constant 0 : index
    %11 = vector.load %arg5[%c0_9, %c0_10] : memref<1x128xf32, #tpu.memory_space<vmem>>, vector<1x128xf32>
    %12 = vector.broadcast %11 : vector<1x128xf32> to vector<512x128xf32>
    %13 = arith.addf %10, %12 : vector<512x128xf32>
    %14 = tpu.iota {dimensions = array<i32: 1>} : vector<512x128xi32>
    %c2_i32 = arith.constant 2 : i32
    %15 = vector.broadcast %c2_i32 : i32 to vector<512x128xi32>
    %16 = arith.cmpi slt, %14, %15 : vector<512x128xi32>
    %17 = arith.negf %13 : vector<512x128xf32>
    %18 = math.exp %17 : vector<512x128xf32>
    %cst_11 = arith.constant 1.000000e+00 : f32
    %19 = vector.broadcast %cst_11 : f32 to vector<512x128xf32>
    %20 = arith.addf %19, %18 : vector<512x128xf32>
    %21 = arith.divf %19, %20 : vector<512x128xf32>
    %22 = arith.select %16, %21, %13 : vector<512x128xi1>, vector<512x128xf32>
    %c0_12 = arith.constant 0 : index
    %c0_13 = arith.constant 0 : index
    %23 = vector.load %arg6[%c0_12, %c0_13] : memref<512x128xf32, #tpu.memory_space<vmem>>, vector<512x128xf32>
    tpu.vector_store %arg6[%c0_12, %c0_13], %22 {strides = array<i32>} : memref<512x128xf32, #tpu.memory_space<vmem>>, vector<512x128xf32>,
    return
  }
  func.func @transform_0(%arg0: i32) -> (i32, i32) {
    %c0_i32 = arith.constant 0 : i32
    %c0_i32_0 = arith.constant 0 : i32
    return %arg0, %c0_i32 : i32, i32
  }
  func.func @transform_1(%arg0: i32) -> (i32, i32) {
    %c0_i32 = arith.constant 0 : i32
    %c0_i32_0 = arith.constant 0 : i32
    %c0_i32_1 = arith.constant 0 : i32
    return %c0_i32, %c0_i32_0 : i32, i32
  }
  func.func @transform_2(%arg0: i32) -> (i32, i32) {
    %c0_i32 = arith.constant 0 : i32
    %c0_i32_0 = arith.constant 0 : i32
    %c0_i32_1 = arith.constant 0 : i32
    return %c0_i32, %c0_i32_0 : i32, i32
  }
  func.func @transform_3(%arg0: i32) -> (i32, i32) {
    %c0_i32 = arith.constant 0 : i32
    %c0_i32_0 = arith.constant 0 : i32
    %c0_i32_1 = arith.constant 0 : i32
    return %c0_i32, %c0_i32_0 : i32, i32
  }
  func.func @transform_4(%arg0: i32) -> (i32, i32) {
    %c0_i32 = arith.constant 0 : i32
    %c0_i32_0 = arith.constant 0 : i32
    %c0_i32_1 = arith.constant 0 : i32
    return %c0_i32, %c0_i32_0 : i32, i32
  }
  func.func @transform_5(%arg0: i32) -> (i32, i32) {
    %c0_i32 = arith.constant 0 : i32
    %c0_i32_0 = arith.constant 0 : i32
    return %arg0, %c0_i32 : i32, i32
  }
}

</mosaic_0001>

<bundles_post_ra>
// kernel: centernet_forward.1
= control target key start
LH: loop header
LB: loop body
LE: loop exit
PB: predicated region body
PF: predicated region fallthrough
CT: control target
= control target key end

     0   :  { %s3095_s18 = smov 0   ;;  %s4812_s0 = inlined_call_operand.vmem [shape: bf16[2048,128], index: 0, kind: input, shape index: {}]   ;;  %s4813_s1 = inlined_call_operand.vmem [shape: bf16[128,128], index: 1, kind: input, shape index: {}]   ;;  %s4814_s2 = inlined_call_operand.vmem [shape: f32[1,128], index: 2, kind: input, shape index: {}]   ;;  %s4815_s3 = inlined_call_operand.vmem [shape: bf16[128,128], index: 3, kind: input, shape index: {}]   ;;  %s4816_s4 = inlined_call_operand.vmem [shape: f32[1,128], index: 4, kind: input, shape index: {}]   ;;  %s4817_s5 = inlined_call_operand.vmem [shape: f32[2048,128], index: 5, kind: output, shape index: {}]  }
   0x1 LB: > { %s2457_s19 = sadd.s32 4294967295, %s3063_s18   ;;  %p2461_p0 = scmp.ge.s32.totalorder %s3063_s18, 1  ;;  %s3063_s18 = sphi %s3095_s18, %s15_s18  }
   0x2   : > { %p188_p1 = scmp.lt.s32.totalorder %s3063_s18, 5 }
   0x4   : > { %p189_p2 = pnand %p2461_p0, %p188_p1 }
   0x5   : > { %s2462_s28 = sshll.u32 (!%p189_p2), %s2457_s19, 6 }
   0x6   : > { %192 = sbr.rel (%p189_p2) target bundleno = 646 (0x286), region = 40  ;;  %p217_p3 = scmp.lt.s32.totalorder (!%p189_p2), %s2462_s28, 255 }
   0xb   : > { %v2763_v0 = vld [vmem:[%s4813_s1 + $0x38] sm:$0xff]  ;;  %v2762_v1 = vld [vmem:[%s4813_s1 + $0x30] sm:$0xff]  ;;  %v2761_v2 = vld [vmem:[%s4813_s1 + $0x28] sm:$0xff]  ;;  %s4921_s28 = smov (!%p217_p3, %s2462_s28), 255 }
   0xc   : > { %552 = vmatpush.bf16.msra.mxu0 %v2763_v0  ;;  %2772 = vmatpush.bf16.msra.mxu2 %v2763_v0  ;;  %v2760_v3 = vld [vmem:[%s4813_s1 + $0x20] sm:$0xff]  ;;  %v2759_v4 = vld [vmem:[%s4813_s1 + $0x18] sm:$0xff]  ;;  %v2758_v5 = vld [vmem:[%s4813_s1 + $0x10] sm:$0xff]  ;;  %s2463_s10 = sshll.u32 %s4921_s28, 2  ;;  %s2465_s13 = sshll.u32 %s4921_s28, 3 }
   0xd   : > { %v2757_v6 = vld [vmem:[%s4813_s1 + $0x8] sm:$0xff]  ;;  %v2756_v7 = vld [vmem:[%s4813_s1] sm:$0xff]  ;;  %s3133_s15 = scalar_lea.vmem %s4812_s0, %s2463_s10  ;;  %v2771_v18 = vld [vmem:[%s4815_s3 + $0x38] sm:$0xff] }
   0xe   : > { %v2724_v8 = vld [vmem:[%s3133_s15] sm:$0xff]  ;;  %v2725_v10 = vld [vmem:[%s3133_s15 + $0x8] sm:$0xff]  ;;  %v2726_v12 = vld [vmem:[%s3133_s15 + $0x10] sm:$0xff]  ;;  %885 = vmatpush.bf16.msra.mxu1 %v2771_v18  ;;  %2780 = vmatpush.bf16.msra.mxu3 %v2771_v18 }
   0xf   : > { %v2740_v9 = vld [vmem:[%s3133_s15 + $0x80] sm:$0xff]  ;;  %v2741_v11 = vld [vmem:[%s3133_s15 + $0x88] sm:$0xff]  ;;  %v2742_v13 = vld [vmem:[%s3133_s15 + $0x90] sm:$0xff] }
  0x10   : > { %553 = vmatpush.bf16.msra.mxu0 %v2762_v1  ;;  %2773 = vmatpush.bf16.msra.mxu2 %v2762_v1  ;;  %v2727_v14 = vld [vmem:[%s3133_s15 + $0x18] sm:$0xff]  ;;  %v2728_v16 = vld [vmem:[%s3133_s15 + $0x20] sm:$0xff]  ;;  %v2729_v19 = vld [vmem:[%s3133_s15 + $0x28] sm:$0xff] }
  0x11   : > { %v2743_v15 = vld [vmem:[%s3133_s15 + $0x98] sm:$0xff]  ;;  %v2744_v17 = vld [vmem:[%s3133_s15 + $0xa0] sm:$0xff]  ;;  %v2745_v20 = vld [vmem:[%s3133_s15 + $0xa8] sm:$0xff] }
  0x12   : > { %v2770_v21 = vld [vmem:[%s4815_s3 + $0x30] sm:$0xff]  ;;  %v2769_v22 = vld [vmem:[%s4815_s3 + $0x28] sm:$0xff]  ;;  %v2768_v23 = vld [vmem:[%s4815_s3 + $0x20] sm:$0xff] }
  0x13   : > { %886 = vmatpush.bf16.msra.mxu1 %v2770_v21  ;;  %2781 = vmatpush.bf16.msra.mxu3 %v2770_v21  ;;  %v2767_v24 = vld [vmem:[%s4815_s3 + $0x18] sm:$0xff]  ;;  %v2730_v25 = vld [vmem:[%s3133_s15 + $0x30] sm:$0xff]  ;;  %v2765_v28 = vld [vmem:[%s4815_s3 + $0x8] sm:$0xff] }
  0x14   : > { %554 = vmatpush.bf16.msra.mxu0 %v2761_v2  ;;  %2774 = vmatpush.bf16.msra.mxu2 %v2761_v2  ;;  %v2746_v26 = vld [vmem:[%s3133_s15 + $0xb0] sm:$0xff]  ;;  %v2764_v29 = vld [vmem:[%s4815_s3] sm:$0xff]  ;;  %v2731_v30 = vld [vmem:[%s3133_s15 + $0x38] sm:$0xff] }
  0x15   : > { %v2766_v27 = vld [vmem:[%s4815_s3 + $0x10] sm:$0xff]  ;;  %v2747_v31 = vld [vmem:[%s3133_s15 + $0xb8] sm:$0xff]  ;;  %v2732_v32 = vld [vmem:[%s3133_s15 + $0x40] sm:$0xff] }
  0x16   : > { %v2748_v33 = vld [vmem:[%s3133_s15 + $0xc0] sm:$0xff]  ;;  %v2733_v46 = vld [vmem:[%s3133_s15 + $0x48] sm:$0xff]  ;;  %v2734_v62 = vld [vmem:[%s3133_s15 + $0x50] sm:$0xff] }
  0x17   : > { %887 = vmatpush.bf16.msra.mxu1 %v2769_v22  ;;  %2782 = vmatpush.bf16.msra.mxu3 %v2769_v22  ;;  %v3180_v35 = vld [vmem:[%s4814_s2] ss:$0 sm:$0xff]  ;;  %v2749_v47 = vld [vmem:[%s3133_s15 + $0xc8] sm:$0xff]  ;;  %v2750_v63 = vld [vmem:[%s3133_s15 + $0xd0] sm:$0xff] }
  0x18   : > { %555 = vmatpush.bf16.msra.mxu0 %v2760_v3  ;;  %2775 = vmatpush.bf16.msra.mxu2 %v2760_v3 }
  0x1b   : > { %888 = vmatpush.bf16.msra.mxu1 %v2768_v23  ;;  %2783 = vmatpush.bf16.msra.mxu3 %v2768_v23 }
  0x1c   : > { %556 = vmatpush.bf16.msra.mxu0 %v2759_v4  ;;  %2776 = vmatpush.bf16.msra.mxu2 %v2759_v4 }
  0x1f   : > { %889 = vmatpush.bf16.msra.mxu1 %v2767_v24  ;;  %2784 = vmatpush.bf16.msra.mxu3 %v2767_v24 }
  0x20   : > { %557 = vmatpush.bf16.msra.mxu0 %v2758_v5  ;;  %2777 = vmatpush.bf16.msra.mxu2 %v2758_v5 }
  0x23   : > { %890 = vmatpush.bf16.msra.mxu1 %v2766_v27  ;;  %2785 = vmatpush.bf16.msra.mxu3 %v2766_v27 }
  0x24   : > { %558 = vmatpush.bf16.msra.mxu0 %v2757_v6  ;;  %2778 = vmatpush.bf16.msra.mxu2 %v2757_v6 }
  0x27   : > { %891 = vmatpush.bf16.msra.mxu1 %v2765_v28  ;;  %2786 = vmatpush.bf16.msra.mxu3 %v2765_v28 }
  0x28   : > { %559 = vmatpush.bf16.msra.mxu0 %v2756_v7  ;;  %2779 = vmatpush.bf16.msra.mxu2 %v2756_v7 }
  0x2b   : > { %560 = vmatmul.bf16.vlgmr.msra.gmra.mxu0 %v2724_v8  ;;  %640 = vmatmul.bf16.vlgmr.msra.gmra.mxu2 %v2740_v9 }
  0x2c   : > { %892 = vmatpush.bf16.msra.mxu1 %v2764_v29  ;;  %2787 = vmatpush.bf16.msra.mxu3 %v2764_v29 }
  0x3b   : > { %565 = vmatmul.bf16.gmra.mxu0 %v2725_v10  ;;  %645 = vmatmul.bf16.gmra.mxu2 %v2741_v11 }
  0x4b   : > { %570 = vmatmul.bf16.gmra.mxu0 %v2726_v12  ;;  %650 = vmatmul.bf16.gmra.mxu2 %v2742_v13 }
  0x5b   : > { %575 = vmatmul.bf16.gmra.mxu0 %v2727_v14  ;;  %655 = vmatmul.bf16.gmra.mxu2 %v2743_v15  ;;  %v2735_v14 = vld [vmem:[%s3133_s15 + $0x58] sm:$0xff] }
  0x5c   : > { %v2751_v15 = vld [vmem:[%s3133_s15 + $0xd8] sm:$0xff] }
  0x6b   : > { %580 = vmatmul.bf16.gmra.mxu0 %v2728_v16  ;;  %660 = vmatmul.bf16.gmra.mxu2 %v2744_v17 }
  0x7b   : > { %585 = vmatmul.bf16.gmra.mxu0 %v2729_v19  ;;  %665 = vmatmul.bf16.gmra.mxu2 %v2745_v20 }
  0x8b   : > { %590 = vmatmul.bf16.gmra.mxu0 %v2730_v25  ;;  %670 = vmatmul.bf16.gmra.mxu2 %v2746_v26 }
  0x9b   : > { %595 = vmatmul.bf16.gmra.mxu0 %v2731_v30  ;;  %675 = vmatmul.bf16.gmra.mxu2 %v2747_v31  ;;  %v2736_v30 = vld [vmem:[%s3133_s15 + $0x60] sm:$0xff] }
  0x9c   : > { %v2752_v31 = vld [vmem:[%s3133_s15 + $0xe0] sm:$0xff] }
  0xa8   : > { %v561_v34 = vpop.f32.mrf.mxu0 }
  0xa9   : > { %v562_v36 = vadd.f32 %v3180_v35, %v561_v34 }
  0xab   : > { %600 = vmatmul.bf16.gmra.mxu0 %v2732_v32  ;;  %680 = vmatmul.bf16.gmra.mxu2 %v2748_v33  ;;  %v721_v39 = vmax.f32 %v562_v36, 0.0 }
  0xae   : > { %v641_v37 = vpop.f32.mrf.mxu2 }
  0xaf   : > { %v642_v42 = vadd.f32 %v3180_v35, %v641_v37 }
  0xb0   : > { %v563_v38 = vpop.f32.mrf.mxu0 }
  0xb1   : > { %v564_v40 = vadd.f32 %v3180_v35, %v563_v38  ;;  %v753_v49 = vmax.f32 %v642_v42, 0.0 }
  0xb3   : > { %v722_v41 = vmax.f32 %v564_v40, 0.0 }
  0xb5   : > { %v785_v43 = vpack.c.bf16 %v722_v41, %v721_v39 }
  0xb6   : > { %v643_v44 = vpop.f32.mrf.mxu2 }
  0xb7   : > { %v644_v45 = vadd.f32 %v3180_v35, %v643_v44  ;;  %893 = vmatmul.bf16.vlgmr.msra.gmra.mxu1 %v785_v43 }
  0xb8   : > { %v566_v48 = vpop.f32.mrf.mxu0 }
  0xb9   : > { %v754_v50 = vmax.f32 %v644_v45, 0.0  ;;  %v567_v52 = vadd.f32 %v3180_v35, %v566_v48  ;;  %v2753_v48 = vld [vmem:[%s3133_s15 + $0xe8] sm:$0xff] }
  0xbb   : > { %605 = vmatmul.bf16.gmra.mxu0 %v2733_v46  ;;  %685 = vmatmul.bf16.gmra.mxu2 %v2749_v47  ;;  %v801_v51 = vpack.c.bf16 %v754_v50, %v753_v49  ;;  %v723_v55 = vmax.f32 %v567_v52, 0.0  ;;  %v2737_v47 = vld [vmem:[%s3133_s15 + $0x68] sm:$0xff] }
  0xbd   : > { %973 = vmatmul.bf16.vlgmr.msra.gmra.mxu3 %v801_v51 }
  0xbe   : > { %v646_v53 = vpop.f32.mrf.mxu2 }
  0xbf   : > { %v647_v58 = vadd.f32 %v3180_v35, %v646_v53 }
  0xc0   : > { %v568_v54 = vpop.f32.mrf.mxu0 }
  0xc1   : > { %v569_v56 = vadd.f32 %v3180_v35, %v568_v54  ;;  %v755_v1 = vmax.f32 %v647_v58, 0.0 }
  0xc3   : > { %v724_v57 = vmax.f32 %v569_v56, 0.0 }
  0xc5   : > { %v786_v59 = vpack.c.bf16 %v724_v57, %v723_v55 }
  0xc6   : > { %v648_v60 = vpop.f32.mrf.mxu2 }
  0xc7   : > { %v649_v61 = vadd.f32 %v3180_v35, %v648_v60  ;;  %898 = vmatmul.bf16.gmra.mxu1 %v786_v59 }
  0xc8   : > { %v571_v0 = vpop.f32.mrf.mxu0 }
  0xc9   : > { %v756_v2 = vmax.f32 %v649_v61, 0.0  ;;  %v572_v4 = vadd.f32 %v3180_v35, %v571_v0  ;;  %v2754_v0 = vld [vmem:[%s3133_s15 + $0xf0] sm:$0xff] }
  0xcb   : > { %610 = vmatmul.bf16.gmra.mxu0 %v2734_v62  ;;  %690 = vmatmul.bf16.gmra.mxu2 %v2750_v63  ;;  %v802_v3 = vpack.c.bf16 %v756_v2, %v755_v1  ;;  %v725_v7 = vmax.f32 %v572_v4, 0.0  ;;  %v2738_v63 = vld [vmem:[%s3133_s15 + $0x70] sm:$0xff] }
  0xcd   : > { %978 = vmatmul.bf16.gmra.mxu3 %v802_v3 }
  0xce   : > { %v651_v5 = vpop.f32.mrf.mxu2 }
  0xcf   : > { %v652_v10 = vadd.f32 %v3180_v35, %v651_v5 }
  0xd0   : > { %v573_v6 = vpop.f32.mrf.mxu0 }
  0xd1   : > { %v574_v8 = vadd.f32 %v3180_v35, %v573_v6  ;;  %v757_v17 = vmax.f32 %v652_v10, 0.0 }
  0xd3   : > { %v726_v9 = vmax.f32 %v574_v8, 0.0 }
  0xd5   : > { %v787_v11 = vpack.c.bf16 %v726_v9, %v725_v7 }
  0xd6   : > { %v653_v12 = vpop.f32.mrf.mxu2 }
  0xd7   : > { %v654_v13 = vadd.f32 %v3180_v35, %v653_v12  ;;  %903 = vmatmul.bf16.gmra.mxu1 %v787_v11 }
  0xd8   : > { %v576_v16 = vpop.f32.mrf.mxu0 }
  0xd9   : > { %v758_v18 = vmax.f32 %v654_v13, 0.0  ;;  %v577_v20 = vadd.f32 %v3180_v35, %v576_v16  ;;  %v2755_v16 = vld [vmem:[%s3133_s15 + $0xf8] sm:$0xff] }
  0xdb   : > { %615 = vmatmul.bf16.gmra.mxu0 %v2735_v14  ;;  %695 = vmatmul.bf16.gmra.mxu2 %v2751_v15  ;;  %v803_v19 = vpack.c.bf16 %v758_v18, %v757_v17  ;;  %v727_v23 = vmax.f32 %v577_v20, 0.0  ;;  %v2739_v15 = vld [vmem:[%s3133_s15 + $0x78] sm:$0xff]  ;;  %s3293_s15 = scalar_lea.vmem %s4817_s5, %s2465_s13 }
  0xdd   : > { %983 = vmatmul.bf16.gmra.mxu3 %v803_v19 }
  0xde   : > { %v656_v21 = vpop.f32.mrf.mxu2 }
  0xdf   : > { %v657_v26 = vadd.f32 %v3180_v35, %v656_v21 }
  0xe0   : > { %v578_v22 = vpop.f32.mrf.mxu0 }
  0xe1   : > { %v579_v24 = vadd.f32 %v3180_v35, %v578_v22  ;;  %v759_v33 = vmax.f32 %v657_v26, 0.0 }
  0xe3   : > { %v728_v25 = vmax.f32 %v579_v24, 0.0 }
  0xe5   : > { %v788_v27 = vpack.c.bf16 %v728_v25, %v727_v23 }
  0xe6   : > { %v658_v28 = vpop.f32.mrf.mxu2 }
  0xe7   : > { %v659_v29 = vadd.f32 %v3180_v35, %v658_v28  ;;  %908 = vmatmul.bf16.gmra.mxu1 %v788_v27 }
  0xe8   : > { %v581_v32 = vpop.f32.mrf.mxu0 }
  0xe9   : > { %v760_v34 = vmax.f32 %v659_v29, 0.0  ;;  %v582_v37 = vadd.f32 %v3180_v35, %v581_v32 }
  0xeb   : > { %620 = vmatmul.bf16.gmra.mxu0 %v2736_v30  ;;  %700 = vmatmul.bf16.gmra.mxu2 %v2752_v31  ;;  %v804_v36 = vpack.c.bf16 %v760_v34, %v759_v33  ;;  %v729_v40 = vmax.f32 %v582_v37, 0.0 }
  0xed   : > { %988 = vmatmul.bf16.gmra.mxu3 %v804_v36 }
  0xee   : > { %v661_v38 = vpop.f32.mrf.mxu2 }
  0xef   : > { %v662_v43 = vadd.f32 %v3180_v35, %v661_v38 }
  0xf0   : > { %v583_v39 = vpop.f32.mrf.mxu0 }
  0xf1   : > { %v584_v41 = vadd.f32 %v3180_v35, %v583_v39  ;;  %v761_v50 = vmax.f32 %v662_v43, 0.0 }
  0xf3   : > { %v730_v42 = vmax.f32 %v584_v41, 0.0  ;;  %v3233_v41 = vld [vmem:[%s4816_s4] ss:$0 sm:$0xff] }
  0xf5   : > { %v789_v44 = vpack.c.bf16 %v730_v42, %v729_v40 }
  0xf6   : > { %v663_v45 = vpop.f32.mrf.mxu2 }
  0xf7   : > { %v664_v46 = vadd.f32 %v3180_v35, %v663_v45  ;;  %913 = vmatmul.bf16.gmra.mxu1 %v789_v44 }
  0xf8   : > { %v586_v49 = vpop.f32.mrf.mxu0 }
  0xf9   : > { %v762_v51 = vmax.f32 %v664_v46, 0.0  ;;  %v587_v53 = vadd.f32 %v3180_v35, %v586_v49 }
  0xfb   : > { %625 = vmatmul.bf16.gmra.mxu0 %v2737_v47  ;;  %705 = vmatmul.bf16.gmra.mxu2 %v2753_v48  ;;  %v805_v52 = vpack.c.bf16 %v762_v51, %v761_v50  ;;  %v731_v56 = vmax.f32 %v587_v53, 0.0 }
  0xfd   : > { %993 = vmatmul.bf16.gmra.mxu3 %v805_v52 }
  0xfe   : > { %v666_v54 = vpop.f32.mrf.mxu2 }
  0xff   : > { %v667_v59 = vadd.f32 %v3180_v35, %v666_v54 }
 0x100   : > { %v588_v55 = vpop.f32.mrf.mxu0 }
 0x101   : > { %v589_v57 = vadd.f32 %v3180_v35, %v588_v55  ;;  %v763_v2 = vmax.f32 %v667_v59, 0.0 }
 0x103   : > { %v732_v58 = vmax.f32 %v589_v57, 0.0 }
 0x105   : > { %v790_v60 = vpack.c.bf16 %v732_v58, %v731_v56 }
 0x106   : > { %v668_v61 = vpop.f32.mrf.mxu2 }
 0x107   : > { %v669_v62 = vadd.f32 %v3180_v35, %v668_v61  ;;  %918 = vmatmul.bf16.gmra.mxu1 %v790_v60 }
 0x108   : > { %v591_v1 = vpop.f32.mrf.mxu0 }
 0x109   : > { %v764_v3 = vmax.f32 %v669_v62, 0.0  ;;  %v592_v5 = vadd.f32 %v3180_v35, %v591_v1 }
 0x10b   : > { %630 = vmatmul.bf16.gmra.mxu0 %v2738_v63  ;;  %710 = vmatmul.bf16.gmra.mxu2 %v2754_v0  ;;  %v806_v4 = vpack.c.bf16 %v764_v3, %v763_v2  ;;  %v733_v8 = vmax.f32 %v592_v5, 0.0 }
 0x10d   : > { %998 = vmatmul.bf16.gmra.mxu3 %v806_v4 }
 0x10e   : > { %v671_v6 = vpop.f32.mrf.mxu2 }
 0x10f   : > { %v672_v11 = vadd.f32 %v3180_v35, %v671_v6 }
 0x110   : > { %v593_v7 = vpop.f32.mrf.mxu0 }
 0x111   : > { %v594_v9 = vadd.f32 %v3180_v35, %v593_v7  ;;  %v765_v18 = vmax.f32 %v672_v11, 0.0 }
 0x113   : > { %v734_v10 = vmax.f32 %v594_v9, 0.0 }
 0x115   : > { %v791_v12 = vpack.c.bf16 %v734_v10, %v733_v8  ;;  %v1054_v8 = vlaneseq }
 0x116   : > { %v673_v13 = vpop.f32.mrf.mxu2 }
 0x117   : > { %v674_v14 = vadd.f32 %v3180_v35, %v673_v13  ;;  %923 = vmatmul.bf16.gmra.mxu1 %v791_v12 }
 0x118   : > { %v596_v17 = vpop.f32.mrf.mxu0 }
 0x119   : > { %v766_v19 = vmax.f32 %v674_v14, 0.0  ;;  %v597_v21 = vadd.f32 %v3180_v35, %v596_v17 }
 0x11b   : > { %635 = vmatmul.bf16.gmra.mxu0 %v2739_v15  ;;  %715 = vmatmul.bf16.gmra.mxu2 %v2755_v16  ;;  %v807_v20 = vpack.c.bf16 %v766_v19, %v765_v18  ;;  %v735_v24 = vmax.f32 %v597_v21, 0.0 }
 0x11d   : > { %1003 = vmatmul.bf16.gmra.mxu3 %v807_v20  ;;  %v3263_v20 = vand.u32 127, %v1054_v8 }
 0x11e   : > { %v676_v22 = vpop.f32.mrf.mxu2 }
 0x11f   : > { %v677_v27 = vadd.f32 %v3180_v35, %v676_v22  ;;  %vm1056_vm1 = vcmp.lt.s32.totalorder %v3263_v20, 2 }
 0x120   : > { %v598_v23 = vpop.f32.mrf.mxu0 }
 0x121   : > { %v599_v25 = vadd.f32 %v3180_v35, %v598_v23  ;;  %v767_v32 = vmax.f32 %v677_v27, 0.0 }
 0x123   : > { %v736_v26 = vmax.f32 %v599_v25, 0.0 }
 0x125   : > { %v792_v28 = vpack.c.bf16 %v736_v26, %v735_v24 }
 0x126   : > { %v678_v29 = vpop.f32.mrf.mxu2 }
 0x127   : > { %v679_v30 = vadd.f32 %v3180_v35, %v678_v29  ;;  %928 = vmatmul.bf16.gmra.mxu1 %v792_v28 }
 0x128   : > { %v601_v31 = vpop.f32.mrf.mxu0 }
 0x129   : > { %v768_v33 = vmax.f32 %v679_v30, 0.0  ;;  %v602_v36 = vadd.f32 %v3180_v35, %v601_v31 }
 0x12b   : > { %v808_v34 = vpack.c.bf16 %v768_v33, %v767_v32  ;;  %v737_v39 = vmax.f32 %v602_v36, 0.0 }
 0x12d   : > { %1008 = vmatmul.bf16.gmra.mxu3 %v808_v34 }
 0x12e   : > { %v681_v37 = vpop.f32.mrf.mxu2 }
 0x12f   : > { %v682_v44 = vadd.f32 %v3180_v35, %v681_v37 }
 0x130   : > { %v603_v38 = vpop.f32.mrf.mxu0 }
 0x131   : > { %v604_v40 = vadd.f32 %v3180_v35, %v603_v38  ;;  %v769_v51 = vmax.f32 %v682_v44, 0.0 }
 0x133   : > { %v738_v42 = vmax.f32 %v604_v40, 0.0 }
 0x134   : > { %v894_v43 = vpop.f32.mrf.mxu1 }
 0x135   : > { %v3237_v45 = vadd.f32 %v3233_v41, %v894_v43  ;;  %v793_v46 = vpack.c.bf16 %v738_v42, %v737_v39 }
 0x136   : > { %v683_v47 = vpop.f32.mrf.mxu2 }
 0x137   : > { %v2658_v48 = vmul.f32 -1.442695, %v3237_v45  ;;  %v684_v49 = vadd.f32 %v3180_v35, %v683_v47  ;;  %933 = vmatmul.bf16.gmra.mxu1 %v793_v46 }
 0x138   : > { %v606_v50 = vpop.f32.mrf.mxu0 }
 0x139   : > { %2798 = vpow2.f32 %v2658_v48  ;;  %v770_v52 = vmax.f32 %v684_v49, 0.0  ;;  %v607_v55 = vadd.f32 %v3180_v35, %v606_v50 }
 0x13b   : > { %v809_v53 = vpack.c.bf16 %v770_v52, %v769_v51  ;;  %v739_v63 = vmax.f32 %v607_v55, 0.0 }
 0x13c   : > { %v896_v54 = vpop.f32.mrf.mxu1 }
 0x13d   : > { %v3243_v56 = vadd.f32 %v3233_v41, %v896_v54  ;;  %1013 = vmatmul.bf16.gmra.mxu3 %v809_v53 }
 0x13e   : > { %v686_v57 = vpop.f32.mrf.mxu2 }
 0x13f   : > { %v2799_v58 = vpop.eup %2798  ;;  %v2659_v59 = vmul.f32 -1.442695, %v3243_v56  ;;  %v687_v5 = vadd.f32 %v3180_v35, %v686_v57 }
 0x140   : > { %v3246_v60 = vadd.f32 1.0, %v2799_v58  ;;  %v608_v61 = vpop.f32.mrf.mxu0  ;;  %v974_v62 = vpop.f32.mrf.mxu3 }
 0x141   : > { %2800 = vpow2.f32 %v2659_v59  ;;  %v609_v0 = vadd.f32 %v3180_v35, %v608_v61  ;;  %v3250_v1 = vadd.f32 %v3233_v41, %v974_v62  ;;  %v771_v18 = vmax.f32 %v687_v5, 0.0 }
 0x142   : > { %2802 = vrcp.f32 %v3246_v60  ;;  %v1322_v25 = vand.u32 2147483647, %v3246_v60  ;;  %v1324_v26 = vand.u32 2147483648, %v3246_v60  ;;  %vm1318_vm2 = vweird.f32 %v3246_v60 }
 0x143   : > { %v740_v2 = vmax.f32 %v609_v0, 0.0  ;;  %v2690_v3 = vmul.f32 -1.442695, %v3250_v1 }
 0x144   : > { %v899_v4 = vpop.f32.mrf.mxu1  ;;  %v1325_v39 = vor.u32 1.1754944e-38, %v1324_v26  ;;  %vm1323_vm4 = vcmp.eq.f32.partialorder %v1322_v25, 8.507059e+37 }
 0x145   : > { %2804 = vpow2.f32 %v2690_v3  ;;  %v3256_v6 = vadd.f32 %v3233_v41, %v899_v4  ;;  %v794_v7 = vpack.c.bf16 %v740_v2, %v739_v63 }
 0x146   : > { %v688_v9 = vpop.f32.mrf.mxu2 }
 0x147   : > { %v2801_v10 = vpop.eup %2800  ;;  %v2660_v11 = vmul.f32 -1.442695, %v3256_v6  ;;  %v689_v12 = vadd.f32 %v3180_v35, %v688_v9  ;;  %938 = vmatmul.bf16.gmra.mxu1 %v794_v7 }
 0x148   : > { %v2803_v13 = vpop.eup %2802  ;;  %v3260_v14 = vadd.f32 1.0, %v2801_v10  ;;  %v611_v15 = vpop.f32.mrf.mxu0 }
 0x149   : > { %v976_v16 = vpop.f32.mrf.mxu3  ;;  %v1314_v17 = vmul.f32 %v2803_v13, %v3246_v60  ;;  %2806 = vpow2.f32 %v2660_v11  ;;  %v772_v19 = vmax.f32 %v689_v12, 0.0  ;;  %vm1319_vm0 = vweird.f32 %v2803_v13 }
 0x14a   : > { %2808 = vrcp.f32 %v3260_v14  ;;  %v3267_v23 = vadd.f32 %v3233_v41, %v976_v16  ;;  %v1337_v36 = vand.u32 2147483647, %v3260_v14  ;;  %vm1320_vm3 = vmor %vm1318_vm2, %vm1319_vm0  ;;  %v1339_v40 = vand.u32 2147483648, %v3260_v14 }
 0x14b   : > { %v2805_v21 = vpop.eup %2804  ;;  %v1315_v22 = vsub.f32 1.0, %v1314_v17  ;;  %v810_v24 = vpack.c.bf16 %v772_v19, %v771_v18  ;;  %v3288_v43 = vadd.f32 %v3180_v35, %v611_v15  ;;  %vm1333_vm5 = vweird.f32 %v3260_v14 }
 0x14c   : > { %v3271_v27 = vadd.f32 1.0, %v2805_v21  ;;  %v901_v28 = vpop.f32.mrf.mxu1  ;;  %v2691_v30 = vmul.f32 -1.442695, %v3267_v23  ;;  %vm3303_vm6 = vcmp.eq.f32.partialorder %v1337_v36, 8.507059e+37  ;;  %v1340_v57 = vor.u32 1.1754944e-38, %v1339_v40 }
 0x14d   : > { %v1316_v29 = vmul.f32 %v2803_v13, %v1315_v22  ;;  %v3275_v31 = vadd.f32 %v3233_v41, %v901_v28  ;;  %1018 = vmatmul.bf16.gmra.mxu3 %v810_v24  ;;  %v741_v58 = vmax.f32 %v3288_v43, 0.0 }
 0x14e   : > { %2810 = vrcp.f32 %v3271_v27  ;;  %v691_v32 = vpop.f32.mrf.mxu2  ;;  %v1802_v50 = vand.u32 2147483647, %v3271_v27  ;;  %v1804_v51 = vand.u32 2147483648, %v3271_v27  ;;  %vm1798_vm7 = vweird.f32 %v3271_v27 }
 0x14f   : > { %v2807_v33 = vpop.eup %2806  ;;  %v1317_v34 = vadd.f32 %v2803_v13, %v1316_v29  ;;  %2812 = vpow2.f32 %v2691_v30  ;;  %v2661_v37 = vmul.f32 -1.442695, %v3275_v31  ;;  %v3315_v63 = vadd.f32 %v3180_v35, %v691_v32 }
 0x150   : > { %v2809_v38 = vpop.eup %2808  ;;  %v3285_v42 = vadd.f32 1.0, %v2807_v33  ;;  %v613_v44 = vpop.f32.mrf.mxu0  ;;  %vm3317_vm9 = vcmp.eq.f32.partialorder %v1802_v50, 8.507059e+37  ;;  %v1805_v2 = vor.u32 1.1754944e-38, %v1804_v51 }
 0x151   : > { %v979_v46 = vpop.f32.mrf.mxu3  ;;  %v1321_v47 = vsel %vm1320_vm3, %v2803_v13, %v1317_v34  ;;  %v1329_v48 = vmul.f32 %v2809_v38, %v3260_v14  ;;  %2814 = vpow2.f32 %v2661_v37  ;;  %vm1334_vm8 = vweird.f32 %v2809_v38 }
 0x152   : > { %v1326_v49 = vsel %vm1323_vm4, %v1325_v39, %v1321_v47  ;;  %2816 = vrcp.f32 %v3285_v42  ;;  %v3311_v59 = vadd.f32 %v3233_v41, %v979_v46  ;;  %v614_v4 = vadd.f32 %v3180_v35, %v613_v44  ;;  %vm1335_vm11 = vmor %vm1333_vm5, %vm1334_vm8 }
 0x153   : > { %v2273_v52 = vsel %vm1056_vm1, %v1326_v49, %v3237_v45  ;;  %v1330_v53 = vsub.f32 1.0, %v1329_v48  ;;  %vm1348_vm10 = vweird.f32 %v3285_v42  ;;  %v1352_v12 = vand.u32 2147483647, %v3285_v42 }
 0x154   : > { %v2811_v55 = vpop.eup %2810  ;;  %2337 = vst [vmem:[%s3293_s15] sm:$0xff] %v2273_v52  ;;  %v904_v60 = vpop.f32.mrf.mxu1  ;;  %v2692_v10 = vmul.f32 -1.442695, %v3311_v59  ;;  %v1354_v22 = vand.u32 2147483648, %v3285_v42  ;;  %v742_v25 = vmax.f32 %v614_v4, 0.0  ;;  %v773_v32 = vmax.f32 %v3315_v63, 0.0 }
 0x155   : > { %v2813_v61 = vpop.eup %2812  ;;  %v1331_v45 = vmul.f32 %v2809_v38, %v1330_v53  ;;  %v1794_v62 = vmul.f32 %v2811_v55, %v3271_v27  ;;  %vm1799_vm12 = vweird.f32 %v2811_v55  ;;  %v3331_v13 = vadd.f32 %v3233_v41, %v904_v60 }
 0x156   : > { %v3321_v3 = vadd.f32 1.0, %v2813_v61  ;;  %v693_v5 = vpop.f32.mrf.mxu2  ;;  %vm1800_vm13 = vmor %vm1798_vm7, %vm1799_vm12  ;;  %vm3355_vm15 = vcmp.eq.f32.partialorder %v1352_v12, 8.507059e+37  ;;  %v1355_v40 = vor.u32 1.1754944e-38, %v1354_v22  ;;  %v795_v43 = vpack.c.bf16 %v742_v25, %v741_v58 }
 0x157   : > { %v2815_v7 = vpop.eup %2814  ;;  %v1332_v8 = vadd.f32 %v2809_v38, %v1331_v45  ;;  %v1795_v9 = vsub.f32 1.0, %v1794_v62  ;;  %v694_v19 = vadd.f32 %v3180_v35, %v693_v5 }
 0x158   : > { %v2817_v11 = vpop.eup %2816  ;;  %2818 = vrcp.f32 %v3321_v3  ;;  %v3335_v21 = vpop.f32.mrf.mxu0  ;;  %v3340_v24 = vadd.f32 1.0, %v2815_v7  ;;  %v1817_v30 = vand.u32 2147483647, %v3321_v3  ;;  %vm1813_vm0 = vweird.f32 %v3321_v3  ;;  %943 = vmatmul.bf16.gmra.mxu1 %v795_v43 }
 0x159   : > { %v981_v15 = vpop.f32.mrf.mxu3  ;;  %v1336_v16 = vsel %vm1335_vm11, %v2809_v38, %v1332_v8  ;;  %v1796_v17 = vmul.f32 %v2811_v55, %v1795_v9  ;;  %v1344_v18 = vmul.f32 %v2817_v11, %v3285_v42  ;;  %2820 = vpow2.f32 %v2692_v10 }
 0x15a   : > { %v1341_v14 = vsel %vm3303_vm6, %v1340_v57, %v1336_v16  ;;  %vm1349_vm14 = vweird.f32 %v2817_v11  ;;  %2822 = vrcp.f32 %v3340_v24  ;;  %v774_v37 = vmax.f32 %v694_v19, 0.0 }
 0x15b   : > { %v2274_v26 = vsel %vm1056_vm1, %v1341_v14, %v3243_v56  ;;  %v1797_v28 = vadd.f32 %v2811_v55, %v1796_v17  ;;  %v1345_v29 = vsub.f32 1.0, %v1344_v18  ;;  %v2662_v56 = vmul.f32 -1.442695, %v3331_v13  ;;  %vm1350_vm2 = vmor %vm1348_vm10, %vm1349_vm14 }
 0x15c   : > { %2338 = vst [vmem:[%s3293_s15 + $0x8] sm:$0xff] %v2274_v26  ;;  %v906_v33 = vpop.f32.mrf.mxu1  ;;  %vm3368_vm3 = vcmp.eq.f32.partialorder %v1817_v30, 8.507059e+37  ;;  %v1819_v50 = vand.u32 2147483648, %v3321_v3  ;;  %v811_v42 = vpack.c.bf16 %v774_v37, %v773_v32  ;;  %v1367_v60 = vand.u32 2147483647, %v3340_v24 }
 0x15d   : > { %v1801_v34 = vsel %vm1800_vm13, %v2811_v55, %v1797_v28  ;;  %v1346_v36 = vmul.f32 %v2817_v11, %v1345_v29  ;;  %2824 = vpow2.f32 %v2662_v56  ;;  %v3377_v55 = vadd.f32 %v3233_v41, %v906_v33 }
 0x15e   : > { %v2819_v38 = vpop.eup %2818  ;;  %v1806_v39 = vsel %vm3317_vm9, %v1805_v2, %v1801_v34  ;;  %v696_v44 = vpop.f32.mrf.mxu2  ;;  %1023 = vmatmul.bf16.gmra.mxu3 %v811_v42  ;;  %v1820_v4 = vor.u32 1.1754944e-38, %v1819_v50  ;;  %vm1363_vm5 = vweird.f32 %v3340_v24  ;;  %v1369_v5 = vand.u32 2147483648, %v3340_v24 }
 0x15f   : > { %v2305_v46 = vsel %vm1056_vm1, %v1806_v39, %v3250_v1  ;;  %v1347_v47 = vadd.f32 %v2817_v11, %v1346_v36  ;;  %v1809_v48 = vmul.f32 %v2819_v38, %v3321_v3  ;;  %v3374_v1 = vadd.f32 %v3233_v41, %v981_v15  ;;  %v2821_v52 = vpop.eup %2820 }
 0x160   : > { %2369 = vst [vmem:[%s3293_s15 + $0x100] sm:$0xff] %v2305_v46  ;;  %v2823_v57 = vpop.eup %2822  ;;  %v3382_v61 = vadd.f32 1.0, %v2821_v52  ;;  %vm1814_vm4 = vweird.f32 %v2819_v38  ;;  %v618_v2 = vpop.f32.mrf.mxu0  ;;  %vm3397_vm8 = vcmp.eq.f32.partialorder %v1367_v60, 8.507059e+37  ;;  %v617_v12 = vadd.f32 %v3180_v35, %v3335_v21 }
 0x161   : > { %v984_v51 = vpop.f32.mrf.mxu3  ;;  %v1351_v53 = vsel %vm1350_vm2, %v2817_v11, %v1347_v47  ;;  %v1810_v54 = vsub.f32 1.0, %v1809_v48  ;;  %v2693_v45 = vmul.f32 -1.442695, %v3374_v1  ;;  %v1359_v0 = vmul.f32 %v2823_v57, %v3340_v24  ;;  %vm1815_vm6 = vmor %vm1813_vm0, %vm1814_vm4 }
 0x162   : > { %v1356_v58 = vsel %vm3355_vm15, %v1355_v40, %v1351_v53  ;;  %2826 = vrcp.f32 %v3382_v61  ;;  %vm1364_vm7 = vweird.f32 %v2823_v57  ;;  %v619_v15 = vadd.f32 %v3180_v35, %v618_v2 }
 0x163   : > { %v2275_v62 = vsel %vm1056_vm1, %v1356_v58, %v3256_v6  ;;  %v1811_v63 = vmul.f32 %v2819_v38, %v1810_v54  ;;  %v1360_v9 = vsub.f32 1.0, %v1359_v0  ;;  %2828 = vpow2.f32 %v2693_v45  ;;  %v2825_v10 = vpop.eup %2824  ;;  %vm1365_vm9 = vmor %vm1363_vm5, %vm1364_vm7 }
 0x164   : > { %2339 = vst [vmem:[%s3293_s15 + $0x10] sm:$0xff] %v2275_v62  ;;  %v909_v7 = vpop.f32.mrf.mxu1  ;;  %v2663_v6 = vmul.f32 -1.442695, %v3377_v55  ;;  %v3404_v18 = vadd.f32 1.0, %v2825_v10  ;;  %v1370_v14 = vor.u32 1.1754944e-38, %v1369_v5  ;;  %v3409_v22 = vadd.f32 %v3233_v41, %v984_v51 }
 0x165   : > { %v1812_v8 = vadd.f32 %v2819_v38, %v1811_v63  ;;  %v1361_v17 = vmul.f32 %v2823_v57, %v1360_v9  ;;  %v3412_v25 = vadd.f32 %v3233_v41, %v909_v7  ;;  %v697_v29 = vadd.f32 %v3180_v35, %v696_v44 }
 0x166   : > { %2830 = vpow2.f32 %v2663_v6  ;;  %v698_v19 = vpop.f32.mrf.mxu2  ;;  %vm1828_vm10 = vweird.f32 %v3382_v61  ;;  %v743_v32 = vmax.f32 %v617_v12, 0.0  ;;  %v2694_v33 = vmul.f32 -1.442695, %v3409_v22 }
 0x167   : > { %v1816_v16 = vsel %vm1815_vm6, %v2819_v38, %v1812_v8  ;;  %v1362_v28 = vadd.f32 %v2823_v57, %v1361_v17  ;;  %2832 = vrcp.f32 %v3404_v18  ;;  %v699_v34 = vadd.f32 %v3180_v35, %v698_v19 }
 0x168   : > { %v1821_v3 = vsel %vm3368_vm3, %v1820_v4, %v1816_v16  ;;  %v2827_v30 = vpop.eup %2826  ;;  %v744_v37 = vmax.f32 %v619_v15, 0.0  ;;  %v2664_v38 = vmul.f32 -1.442695, %v3412_v25  ;;  %v1832_v24 = vand.u32 2147483647, %v3382_v61  ;;  %v621_v49 = vpop.f32.mrf.mxu0 }
 0x169   : > { %v986_v21 = vpop.f32.mrf.mxu3  ;;  %v2306_v26 = vsel %vm1056_vm1, %v1821_v3, %v3267_v23  ;;  %v2829_v36 = vpop.eup %2828  ;;  %v1366_v23 = vsel %vm1365_vm9, %v2823_v57, %v1362_v28  ;;  %v1824_v56 = vmul.f32 %v2827_v30, %v3382_v61  ;;  %v1834_v27 = vand.u32 2147483648, %v3382_v61 }
 0x16a   : > { %2370 = vst [vmem:[%s3293_s15 + $0x108] sm:$0xff] %v2306_v26  ;;  %v1371_v39 = vsel %vm3397_vm8, %v1370_v14, %v1366_v23  ;;  %v3432_v40 = vadd.f32 1.0, %v2829_v36  ;;  %v1382_v48 = vand.u32 2147483647, %v3404_v18  ;;  %2834 = vpow2.f32 %v2694_v33 }
 0x16b   : > { %v2276_v46 = vsel %vm1056_vm1, %v1371_v39, %v3275_v31  ;;  %v1825_v47 = vsub.f32 1.0, %v1824_v56  ;;  %vm1829_vm11 = vweird.f32 %v2827_v30  ;;  %v1384_v50 = vand.u32 2147483648, %v3404_v18 }
 0x16c   : > { %v911_v43 = vpop.f32.mrf.mxu1  ;;  %v2831_v44 = vpop.eup %2830  ;;  %2340 = vst [vmem:[%s3293_s15 + $0x18] sm:$0xff] %v2276_v46  ;;  %2836 = vrcp.f32 %v3432_v40  ;;  %v776_v51 = vmax.f32 %v699_v34, 0.0  ;;  %v796_v42 = vpack.c.bf16 %v744_v37, %v743_v32  ;;  %vm3443_vm12 = vcmp.eq.f32.partialorder %v1832_v24, 8.507059e+37  ;;  %vm1830_vm13 = vmor %vm1828_vm10, %vm1829_vm11 }
 0x16d   : > { %v2833_v52 = vpop.eup %2832  ;;  %v1826_v53 = vmul.f32 %v2827_v30, %v1825_v47  ;;  %v3441_v54 = vadd.f32 1.0, %v2831_v44  ;;  %2838 = vpow2.f32 %v2664_v38  ;;  %v1835_v57 = vor.u32 1.1754944e-38, %v1834_v27 }
 0x16e   : > { %v1374_v58 = vmul.f32 %v2833_v52, %v3404_v18  ;;  %v775_v60 = vmax.f32 %v697_v29, 0.0  ;;  %v1847_v63 = vand.u32 2147483647, %v3432_v40  ;;  %v1849_v0 = vand.u32 2147483648, %v3432_v40  ;;  %948 = vmatmul.bf16.gmra.mxu1 %v796_v42  ;;  %v701_v10 = vpop.f32.mrf.mxu2 }
 0x16f   : > { %v1827_v62 = vadd.f32 %v2827_v30, %v1826_v53  ;;  %2840 = vrcp.f32 %v3441_v54  ;;  %vm1378_vm14 = vweird.f32 %v3404_v18  ;;  %vm3457_vm15 = vcmp.eq.f32.partialorder %v1382_v48, 8.507059e+37 }
 0x170   : > { %v1375_v2 = vsub.f32 1.0, %v1374_v58  ;;  %v1385_v5 = vor.u32 1.1754944e-38, %v1384_v50  ;;  %v2835_v7 = vpop.eup %2834  ;;  %vm1843_vm0 = vweird.f32 %v3432_v40  ;;  %v3463_v9 = vadd.f32 %v3233_v41, %v986_v21  ;;  %v623_v23 = vpop.f32.mrf.mxu0 }
 0x171   : > { %v3448_v45 = vpop.f32.mrf.mxu3  ;;  %v1831_v8 = vsel %vm1830_vm13, %v2827_v30, %v1827_v62  ;;  %v812_v6 = vpack.c.bf16 %v776_v51, %v775_v60  ;;  %vm1379_vm2 = vweird.f32 %v2833_v52  ;;  %v3467_v15 = vadd.f32 1.0, %v2835_v7 }
 0x172   : > { %v2837_v61 = vpop.eup %2836  ;;  %v1836_v11 = vsel %vm3443_vm12, %v1835_v57, %v1831_v8  ;;  %v1376_v12 = vmul.f32 %v2833_v52, %v1375_v2  ;;  %vm3475_vm3 = vcmp.eq.f32.partialorder %v1847_v63, 8.507059e+37  ;;  %v1850_v21 = vor.u32 1.1754944e-38, %v1849_v0  ;;  %vm1380_vm5 = vmor %vm1378_vm14, %vm1379_vm2 }
 0x173   : > { %v2839_v17 = vpop.eup %2838  ;;  %v2307_v19 = vsel %vm1056_vm1, %v1836_v11, %v3311_v59  ;;  %v1839_v3 = vmul.f32 %v2837_v61, %v3432_v40  ;;  %v1397_v26 = vand.u32 2147483647, %v3441_v54  ;;  %1028 = vmatmul.bf16.gmra.mxu3 %v812_v6  ;;  %vm1393_vm4 = vweird.f32 %v3441_v54 }
 0x174   : > { %v3469_v16 = vpop.f32.mrf.mxu1  ;;  %2371 = vst [vmem:[%s3293_s15 + $0x110] sm:$0xff] %v2307_v19  ;;  %v1377_v28 = vadd.f32 %v2833_v52, %v1376_v12  ;;  %v1399_v29 = vand.u32 2147483648, %v3441_v54  ;;  %2842 = vrcp.f32 %v3467_v15  ;;  %v622_v59 = vadd.f32 %v3180_v35, %v621_v49 }
 0x175   : > { %v2841_v30 = vpop.eup %2840  ;;  %v1840_v32 = vsub.f32 1.0, %v1839_v3  ;;  %v3488_v33 = vadd.f32 1.0, %v2839_v17  ;;  %v2695_v34 = vmul.f32 -1.442695, %v3463_v9  ;;  %v3492_v36 = vadd.f32 %v3233_v41, %v911_v43 }
 0x176   : > { %v1381_v56 = vsel %vm1380_vm5, %v2833_v52, %v1377_v28  ;;  %vm1844_vm6 = vweird.f32 %v2837_v61  ;;  %v1389_v37 = vmul.f32 %v2841_v30, %v3441_v54  ;;  %v1862_v38 = vand.u32 2147483647, %v3467_v15  ;;  %v703_v60 = vpop.f32.mrf.mxu2 }
 0x177   : > { %v1386_v18 = vsel %vm3457_vm15, %v1385_v5, %v1381_v56  ;;  %v1841_v24 = vmul.f32 %v2837_v61, %v1840_v32  ;;  %v1864_v27 = vand.u32 2147483648, %v3467_v15  ;;  %2844 = vrcp.f32 %v3488_v33  ;;  %vm1845_vm8 = vmor %vm1843_vm0, %vm1844_vm6 }
 0x178   : > { %v2277_v43 = vsel %vm1056_vm1, %v1386_v18, %v3331_v13  ;;  %v1390_v44 = vsub.f32 1.0, %v1389_v37  ;;  %vm3505_vm7 = vcmp.eq.f32.partialorder %v1397_v26, 8.507059e+37  ;;  %v1400_v47 = vor.u32 1.1754944e-38, %v1399_v29  ;;  %v626_v12 = vpop.f32.mrf.mxu0  ;;  %v3558_v26 = vld [vmem:[%s4814_s2] ss:$0 sm:$0xff] }
 0x179   : > { %v3496_v39 = vpop.f32.mrf.mxu3  ;;  %2341 = vst [vmem:[%s3293_s15 + $0x20] sm:$0xff] %v2277_v43  ;;  %v1842_v48 = vadd.f32 %v2837_v61, %v1841_v24  ;;  %v745_v49 = vmax.f32 %v622_v59, 0.0  ;;  %2846 = vpow2.f32 %v2695_v34  ;;  %v2665_v50 = vmul.f32 -1.442695, %v3492_v36 }
 0x17a   : > { %v2843_v51 = vpop.eup %2842  ;;  %v1391_v52 = vmul.f32 %v2841_v30, %v1390_v44  ;;  %vm1394_vm9 = vweird.f32 %v2841_v30  ;;  %vm1858_vm10 = vweird.f32 %v3467_v15  ;;  %v624_v13 = vadd.f32 %v3180_v35, %v623_v23 }
 0x17b   : > { %v1846_v42 = vsel %vm1845_vm8, %v2837_v61, %v1842_v48  ;;  %v1854_v31 = vmul.f32 %v2843_v51, %v3467_v15  ;;  %vm3519_vm11 = vcmp.eq.f32.partialorder %v1862_v38, 8.507059e+37  ;;  %v1865_v58 = vor.u32 1.1754944e-38, %v1864_v27  ;;  %vm1395_vm12 = vmor %vm1393_vm4, %vm1394_vm9 }
 0x17c   : > { %v3516_v53 = vpop.f32.mrf.mxu1  ;;  %v1851_v40 = vsel %vm3475_vm3, %v1850_v21, %v1846_v42  ;;  %v1392_v62 = vadd.f32 %v2841_v30, %v1391_v52  ;;  %2848 = vpow2.f32 %v2665_v50  ;;  %v702_v63 = vadd.f32 %v3180_v35, %v701_v10 }
 0x17d   : > { %v2845_v0 = vpop.eup %2844  ;;  %v2308_v2 = vsel %vm1056_vm1, %v1851_v40, %v3374_v1  ;;  %v1855_v4 = vsub.f32 1.0, %v1854_v31  ;;  %v746_v5 = vmax.f32 %v624_v13, 0.0  ;;  %v3534_v7 = vadd.f32 %v3233_v41, %v3448_v45 }
 0x17e   : > { %2372 = vst [vmem:[%s3293_s15 + $0x118] sm:$0xff] %v2308_v2  ;;  %v1396_v8 = vsel %vm1395_vm12, %v2841_v30, %v1392_v62  ;;  %vm1859_vm13 = vweird.f32 %v2843_v51  ;;  %v1404_v35 = vmul.f32 %v2845_v0, %v3488_v33  ;;  %v3540_v6 = vadd.f32 %v3233_v41, %v3469_v16  ;;  %v706_v24 = vpop.f32.mrf.mxu2 }
 0x17f   : > { %v2847_v54 = vpop.eup %2846  ;;  %v1401_v10 = vsel %vm3505_vm7, %v1400_v47, %v1396_v8  ;;  %v1856_v61 = vmul.f32 %v2843_v51, %v1855_v4  ;;  %v797_v11 = vpack.c.bf16 %v746_v5, %v745_v49  ;;  %v2696_v45 = vmul.f32 -1.442695, %v3534_v7  ;;  %vm1860_vm14 = vmor %vm1858_vm10, %vm1859_vm13 }
 0x180   : > { %v2278_v17 = vsel %vm1056_vm1, %v1401_v10, %v3377_v55  ;;  %v1405_v19 = vsub.f32 1.0, %v1404_v35  ;;  %v3550_v3 = vadd.f32 1.0, %v2847_v54  ;;  %v2666_v16 = vmul.f32 -1.442695, %v3540_v6  ;;  %v628_v31 = vpop.f32.mrf.mxu0 }
 0x181   : > { %v3542_v1 = vpop.f32.mrf.mxu3  ;;  %2342 = vst [vmem:[%s3293_s15 + $0x28] sm:$0xff] %v2278_v17  ;;  %v1857_v14 = vadd.f32 %v2843_v51, %v1856_v61  ;;  %v1414_v21 = vand.u32 2147483648, %v3488_v33  ;;  %2850 = vpow2.f32 %v2696_v45  ;;  %v704_v28 = vadd.f32 %v3558_v26, %v703_v60  ;;  %953 = vmatmul.bf16.gmra.mxu1 %v797_v11 }
 0x182   : > { %v2849_v29 = vpop.eup %2848  ;;  %v1406_v55 = vmul.f32 %v2845_v0, %v1405_v19  ;;  %vm1409_vm15 = vweird.f32 %v2845_v0  ;;  %v1412_v59 = vand.u32 2147483647, %v3488_v33  ;;  %2852 = vrcp.f32 %v3550_v3 }
 0x183   : > { %v1861_v32 = vsel %vm1860_vm14, %v2843_v51, %v1857_v14  ;;  %vm1408_vm0 = vweird.f32 %v3488_v33  ;;  %v3569_v34 = vadd.f32 1.0, %v2849_v29  ;;  %2854 = vpow2.f32 %v2666_v16 }
 0x184   : > { %v3566_v30 = vpop.f32.mrf.mxu1  ;;  %v1866_v23 = vsel %vm3519_vm11, %v1865_v58, %v1861_v32  ;;  %v1407_v15 = vadd.f32 %v2845_v0, %v1406_v55  ;;  %v777_v56 = vmax.f32 %v702_v63, 0.0  ;;  %v778_v37 = vmax.f32 %v704_v28, 0.0  ;;  %vm1410_vm2 = vmor %vm1408_vm0, %vm1409_vm15 }
 0x185   : > { %v2309_v38 = vsel %vm1056_vm1, %v1866_v23, %v3409_v22  ;;  %v1415_v18 = vor.u32 1.1754944e-38, %v1414_v21  ;;  %2856 = vrcp.f32 %v3569_v34  ;;  %vm1413_vm3 = vcmp.eq.f32.partialorder %v1412_v59, 8.507059e+37 }
 0x186   : > { %2373 = vst [vmem:[%s3293_s15 + $0x120] sm:$0xff] %v2309_v38  ;;  %v1411_v33 = vsel %vm1410_vm2, %v2845_v0, %v1407_v15  ;;  %v813_v27 = vpack.c.bf16 %v778_v37, %v777_v56  ;;  %v1877_v47 = vand.u32 2147483647, %v3550_v3  ;;  %v3583_v48 = vadd.f32 %v3233_v41, %v3496_v39  ;;  %v708_v16 = vpop.f32.mrf.mxu2 }
 0x187   : > { %v2851_v44 = vpop.eup %2850  ;;  %v1416_v46 = vsel %vm1413_vm3, %v1415_v18, %v1411_v33  ;;  %v3587_v22 = vadd.f32 %v3233_v41, %v3516_v53  ;;  %v1879_v51 = vand.u32 2147483648, %v3550_v3  ;;  %vm1873_vm4 = vweird.f32 %v3550_v3 }
 0x188   : > { %v2853_v49 = vpop.eup %2852  ;;  %v2279_v50 = vsel %vm1056_vm1, %v1416_v46, %v3412_v25  ;;  %v3593_v52 = vadd.f32 1.0, %v2851_v44  ;;  %1033 = vmatmul.bf16.gmra.mxu3 %v813_v27  ;;  %v627_v39 = vadd.f32 %v3558_v26, %v626_v12  ;;  %v2697_v53 = vmul.f32 -1.442695, %v3583_v48  ;;  %v631_v44 = vpop.f32.mrf.mxu0 }
 0x189   : > { %v3578_v43 = vpop.f32.mrf.mxu3  ;;  %v2855_v13 = vpop.eup %2854  ;;  %2343 = vst [vmem:[%s3293_s15 + $0x30] sm:$0xff] %v2279_v50  ;;  %v1869_v42 = vmul.f32 %v2853_v49, %v3550_v3  ;;  %v1427_v57 = vand.u32 2147483647, %v3569_v34  ;;  %v1429_v25 = vand.u32 2147483648, %v3569_v34  ;;  %v2667_v58 = vmul.f32 -1.442695, %v3587_v22 }
 0x18a   : > { %2858 = vrcp.f32 %v3593_v52  ;;  %vm3606_vm5 = vcmp.eq.f32.partialorder %v1877_v47, 8.507059e+37  ;;  %v3610_v0 = vadd.f32 1.0, %v2855_v13  ;;  %v1880_v2 = vor.u32 1.1754944e-38, %v1879_v51 }
 0x18b   : > { %v2857_v40 = vpop.eup %2856  ;;  %v1870_v62 = vsub.f32 1.0, %v1869_v42  ;;  %2860 = vpow2.f32 %v2697_v53  ;;  %vm1423_vm6 = vweird.f32 %v3569_v34  ;;  %v1894_v5 = vand.u32 2147483648, %v3593_v52 }
 0x18c   : > { %v3604_v60 = vpop.f32.mrf.mxu1  ;;  %v1419_v4 = vmul.f32 %v2857_v40, %v3569_v34  ;;  %vm1874_vm7 = vweird.f32 %v2853_v49  ;;  %2862 = vrcp.f32 %v3610_v0  ;;  %v747_v35 = vmax.f32 %v627_v39, 0.0 }
 0x18d   : > { %v1871_v8 = vmul.f32 %v2853_v49, %v1870_v62  ;;  %vm3616_vm8 = vcmp.eq.f32.partialorder %v1427_v57, 8.507059e+37  ;;  %v1430_v61 = vor.u32 1.1754944e-38, %v1429_v25  ;;  %2864 = vpow2.f32 %v2667_v58  ;;  %vm1875_vm10 = vmor %vm1873_vm4, %vm1874_vm7 }
 0x18e   : > { %v1420_v54 = vsub.f32 1.0, %v1419_v4  ;;  %vm1888_vm9 = vweird.f32 %v3593_v52  ;;  %v1892_v12 = vand.u32 2147483647, %v3593_v52  ;;  %v629_v17 = vadd.f32 %v3558_v26, %v628_v31  ;;  %v711_v63 = vpop.f32.mrf.mxu2 }
 0x18f   : > { %v1872_v45 = vadd.f32 %v2853_v49, %v1871_v8  ;;  %v3627_v19 = vadd.f32 %v3233_v41, %v3542_v1  ;;  %vm1424_vm11 = vweird.f32 %v2857_v40  ;;  %v1895_v28 = vor.u32 1.1754944e-38, %v1894_v5 }
 0x190   : > { %v2859_v14 = vpop.eup %2858  ;;  %v1421_v21 = vmul.f32 %v2857_v40, %v1420_v54  ;;  %v707_v29 = vadd.f32 %v3558_v26, %v706_v24  ;;  %v748_v23 = vmax.f32 %v629_v17, 0.0  ;;  %v3636_v1 = vadd.f32 %v3233_v41, %v3566_v30  ;;  %vm1425_vm12 = vmor %vm1423_vm6, %vm1424_vm11 }
 0x191   : > { %v3620_v11 = vpop.f32.mrf.mxu3  ;;  %v2861_v55 = vpop.eup %2860  ;;  %v1876_v59 = vsel %vm1875_vm10, %v2853_v49, %v1872_v45  ;;  %v1884_v32 = vmul.f32 %v2859_v14, %v3593_v52  ;;  %v709_v37 = vadd.f32 %v3558_v26, %v708_v16  ;;  %v2698_v27 = vmul.f32 -1.442695, %v3627_v19 }
 0x192   : > { %v1881_v15 = vsel %vm3606_vm5, %v1880_v2, %v1876_v59  ;;  %v1422_v3 = vadd.f32 %v2857_v40, %v1421_v21  ;;  %v3640_v56 = vadd.f32 1.0, %v2861_v55  ;;  %v2863_v18 = vpop.eup %2862  ;;  %v798_v33 = vpack.c.bf16 %v748_v23, %v747_v35 }
 0x193   : > { %v2310_v24 = vsel %vm1056_vm1, %v1881_v15, %v3463_v9  ;;  %v1885_v30 = vsub.f32 1.0, %v1884_v32  ;;  %v2865_v46 = vpop.eup %2864  ;;  %v1434_v49 = vmul.f32 %v2863_v18, %v3610_v0  ;;  %v1442_v50 = vand.u32 2147483647, %v3610_v0 }
 0x194   : > { %v3643_v38 = vpop.f32.mrf.mxu1  ;;  %2374 = vst [vmem:[%s3293_s15 + $0x128] sm:$0xff] %v2310_v24  ;;  %v1426_v47 = vsel %vm1425_vm12, %v2857_v40, %v1422_v3  ;;  %2866 = vrcp.f32 %v3640_v56  ;;  %vm1889_vm13 = vweird.f32 %v2859_v14  ;;  %v2668_v51 = vmul.f32 -1.442695, %v3636_v1  ;;  %958 = vmatmul.bf16.gmra.mxu1 %v798_v33 }
 0x195   : > { %v1431_v9 = vsel %vm3616_vm8, %v1430_v61, %v1426_v47  ;;  %v1886_v34 = vmul.f32 %v2859_v14, %v1885_v30  ;;  %v1435_v42 = vsub.f32 1.0, %v1434_v49  ;;  %v1444_v39 = vand.u32 2147483648, %v3610_v0  ;;  %vm1890_vm14 = vmor %vm1888_vm9, %vm1889_vm13 }
 0x196   : > { %v2280_v13 = vsel %vm1056_vm1, %v1431_v9, %v3492_v36  ;;  %v3663_v53 = vadd.f32 1.0, %v2865_v46  ;;  %v779_v25 = vmax.f32 %v707_v29, 0.0  ;;  %2868 = vpow2.f32 %v2698_v27 }
 0x197   : > { %2344 = vst [vmem:[%s3293_s15 + $0x38] sm:$0xff] %v2280_v13  ;;  %v1887_v57 = vadd.f32 %v2859_v14, %v1886_v34  ;;  %v780_v58 = vmax.f32 %v709_v37, 0.0  ;;  %v1436_v40 = vmul.f32 %v2863_v18, %v1435_v42  ;;  %vm1439_vm15 = vweird.f32 %v2863_v18 }
 0x198   : > { %v1907_v62 = vand.u32 2147483647, %v3640_v56  ;;  %2870 = vrcp.f32 %v3663_v53  ;;  %vm1893_vm0 = vcmp.eq.f32.partialorder %v1892_v12, 8.507059e+37  ;;  %vm1438_vm2 = vweird.f32 %v3610_v0 }
 0x199   : > { %v3665_v31 = vpop.f32.mrf.mxu3  ;;  %v1891_v36 = vsel %vm1890_vm14, %v2859_v14, %v1887_v57  ;;  %2872 = vpow2.f32 %v2668_v51  ;;  %v1437_v5 = vadd.f32 %v2863_v18, %v1436_v40  ;;  %vm1443_vm3 = vcmp.eq.f32.partialorder %v1442_v50, 8.507059e+37  ;;  %vm1440_vm4 = vmor %vm1438_vm2, %vm1439_vm15  ;;  %v713_v50 = vpop.f32.mrf.mxu2 }
 0x19a   : > { %v2867_v2 = vpop.eup %2866  ;;  %v1896_v4 = vsel %vm1893_vm0, %v1895_v28, %v1891_v36  ;;  %v814_v8 = vpack.c.bf16 %v780_v58, %v779_v25  ;;  %v1445_v54 = vor.u32 1.1754944e-38, %v1444_v39  ;;  %vm1903_vm5 = vweird.f32 %v3640_v56  ;;  %v633_v28 = vpop.f32.mrf.mxu0  ;;  %v3732_v39 = vld [vmem:[%s4816_s4] ss:$0 sm:$0xff] }
 0x19b   : > { %v2311_v35 = vsel %vm1056_vm1, %v1896_v4, %v3534_v7  ;;  %v1899_v10 = vmul.f32 %v2867_v2, %v3640_v56  ;;  %v1441_v0 = vsel %vm1440_vm4, %v2863_v18, %v1437_v5  ;;  %vm3682_vm6 = vcmp.eq.f32.partialorder %v1907_v62, 8.507059e+37 }
 0x19c   : > { %v3673_v52 = vpop.f32.mrf.mxu1  ;;  %2375 = vst [vmem:[%s3293_s15 + $0x130] sm:$0xff] %v2311_v35  ;;  %v1909_v45 = vand.u32 2147483648, %v3640_v56  ;;  %v3689_v12 = vadd.f32 %v3233_v41, %v3578_v43  ;;  %1038 = vmatmul.bf16.gmra.mxu3 %v814_v8  ;;  %v2869_v7 = vpop.eup %2868  ;;  %v1446_v17 = vsel %vm1443_vm3, %v1445_v54, %v1441_v0  ;;  %v1457_v14 = vand.u32 2147483647, %v3663_v53 }
 0x19d   : > { %v1900_v16 = vsub.f32 1.0, %v1899_v10  ;;  %v3694_v21 = vadd.f32 %v3233_v41, %v3604_v60  ;;  %v2281_v55 = vsel %vm1056_vm1, %v1446_v17, %v3540_v6  ;;  %v3699_v59 = vadd.f32 1.0, %v2869_v7 }
 0x19e   : > { %v2871_v29 = vpop.eup %2870  ;;  %v632_v43 = vadd.f32 %v3558_v26, %v631_v44  ;;  %v2699_v32 = vmul.f32 -1.442695, %v3689_v12  ;;  %2345 = vst [vmem:[%s3293_s15 + $0x40] sm:$0xff] %v2281_v55  ;;  %vm1904_vm7 = vweird.f32 %v2867_v2  ;;  %v1910_v37 = vor.u32 1.1754944e-38, %v1909_v45 }
 0x19f   : > { %v2873_v15 = vpop.eup %2872  ;;  %v1901_v3 = vmul.f32 %v2867_v2, %v1900_v16  ;;  %v1449_v41 = vmul.f32 %v2871_v29, %v3663_v53  ;;  %v2669_v60 = vmul.f32 -1.442695, %v3694_v21  ;;  %v1459_v18 = vand.u32 2147483648, %v3663_v53  ;;  %vm1905_vm8 = vmor %vm1903_vm5, %vm1904_vm7 }
 0x1a0   : > { %2874 = vrcp.f32 %v3699_v59  ;;  %v634_v6 = vadd.f32 %v3558_v26, %v633_v28  ;;  %v3711_v33 = vadd.f32 1.0, %v2873_v15  ;;  %vm1453_vm9 = vweird.f32 %v3663_v53 }
 0x1a1   : > { %v3703_v23 = vpop.f32.mrf.mxu3  ;;  %v1902_v24 = vadd.f32 %v2867_v2, %v1901_v3  ;;  %v1450_v30 = vsub.f32 1.0, %v1449_v41  ;;  %2876 = vpow2.f32 %v2699_v32  ;;  %vm3716_vm10 = vcmp.eq.f32.partialorder %v1457_v14, 8.507059e+37 }
 0x1a2   : > { %v749_v44 = vmax.f32 %v632_v43, 0.0  ;;  %2878 = vpow2.f32 %v2669_v60  ;;  %vm1454_vm11 = vweird.f32 %v2871_v29  ;;  %v1460_v9 = vor.u32 1.1754944e-38, %v1459_v18 }
 0x1a3   : > { %v1906_v47 = vsel %vm1905_vm8, %v2867_v2, %v1902_v24  ;;  %v1451_v49 = vmul.f32 %v2871_v29, %v1450_v30  ;;  %2880 = vrcp.f32 %v3711_v33  ;;  %v712_v34 = vadd.f32 %v3558_v26, %v711_v63  ;;  %vm1455_vm12 = vmor %vm1453_vm9, %vm1454_vm11 }
 0x1a4   : > { %v3720_v46 = vpop.f32.mrf.mxu1  ;;  %v1911_v56 = vsel %vm3682_vm6, %v1910_v37, %v1906_v47  ;;  %v750_v51 = vmax.f32 %v634_v6, 0.0  ;;  %v3736_v57 = vadd.f32 %v3732_v39, %v3620_v11  ;;  %v3740_v25 = vadd.f32 %v3732_v39, %v3643_v38  ;;  %v716_v47 = vpop.f32.mrf.mxu2 }
 0x1a5   : > { %v2312_v13 = vsel %vm1056_vm1, %v1911_v56, %v3583_v48  ;;  %v1452_v42 = vadd.f32 %v2871_v29, %v1451_v49  ;;  %v1922_v48 = vand.u32 2147483647, %v3699_v59  ;;  %v1924_v40 = vand.u32 2147483648, %v3699_v59 }
 0x1a6   : > { %v2875_v58 = vpop.eup %2874  ;;  %2376 = vst [vmem:[%s3293_s15 + $0x138] sm:$0xff] %v2312_v13  ;;  %v799_v62 = vpack.c.bf16 %v750_v51, %v749_v44  ;;  %v714_v36 = vadd.f32 %v3558_v26, %v713_v50  ;;  %v1472_v4 = vand.u32 2147483647, %v3711_v33  ;;  %v2700_v5 = vmul.f32 -1.442695, %v3736_v57 }
 0x1a7   : > { %v2877_v11 = vpop.eup %2876  ;;  %v1456_v2 = vsel %vm1455_vm12, %v2871_v29, %v1452_v42  ;;  %v1914_v38 = vmul.f32 %v2875_v58, %v3699_v59  ;;  %v1474_v35 = vand.u32 2147483648, %v3711_v33  ;;  %v2670_v10 = vmul.f32 -1.442695, %v3740_v25 }
 0x1a8   : > { %v2879_v53 = vpop.eup %2878  ;;  %v1461_v8 = vsel %vm3716_vm10, %v1460_v9, %v1456_v2  ;;  %v3756_v54 = vadd.f32 1.0, %v2877_v11  ;;  %963 = vmatmul.bf16.gmra.mxu1 %v799_v62  ;;  %2882 = vpow2.f32 %v2700_v5  ;;  %vm1918_vm13 = vweird.f32 %v3699_v59 }
 0x1a9   : > { %v3748_v63 = vpop.f32.mrf.mxu3  ;;  %v2881_v0 = vpop.eup %2880  ;;  %v2282_v61 = vsel %vm1056_vm1, %v1461_v8, %v3587_v22  ;;  %v1915_v45 = vsub.f32 1.0, %v1914_v38  ;;  %v3762_v7 = vadd.f32 1.0, %v2879_v53  ;;  %v782_v16 = vmax.f32 %v714_v36, 0.0 }
 0x1aa   : > { %2346 = vst [vmem:[%s3293_s15 + $0x48] sm:$0xff] %v2282_v61  ;;  %v1464_v17 = vmul.f32 %v2881_v0, %v3711_v33  ;;  %2884 = vrcp.f32 %v3756_v54  ;;  %vm1919_vm14 = vweird.f32 %v2875_v58  ;;  %vm3770_vm15 = vcmp.eq.f32.partialorder %v1922_v48, 8.507059e+37  ;;  %v636_v22 = vpop.f32.mrf.mxu0 }
 0x1ab   : > { %v1916_v28 = vmul.f32 %v2875_v58, %v1915_v45  ;;  %2886 = vrcp.f32 %v3762_v7  ;;  %v1925_v55 = vor.u32 1.1754944e-38, %v1924_v40  ;;  %vm1468_vm0 = vweird.f32 %v3711_v33  ;;  %vm1920_vm3 = vmor %vm1918_vm13, %vm1919_vm14 }
 0x1ac   : > { %v3768_v14 = vpop.f32.mrf.mxu1  ;;  %v1465_v43 = vsub.f32 1.0, %v1464_v17  ;;  %v781_v32 = vmax.f32 %v712_v34, 0.0  ;;  %vm3776_vm2 = vcmp.eq.f32.partialorder %v1472_v4, 8.507059e+37  ;;  %v1475_v41 = vor.u32 1.1754944e-38, %v1474_v35  ;;  %v718_v3 = vpop.f32.mrf.mxu2 }
 0x1ad   : > { %v1917_v15 = vadd.f32 %v2875_v58, %v1916_v28  ;;  %2888 = vpow2.f32 %v2670_v10  ;;  %vm1469_vm4 = vweird.f32 %v2881_v0  ;;  %v1937_v37 = vand.u32 2147483647, %v3756_v54 }
 0x1ae   : > { %v1466_v60 = vmul.f32 %v2881_v0, %v1465_v43  ;;  %v815_v18 = vpack.c.bf16 %v782_v16, %v781_v32  ;;  %v2883_v24 = vpop.eup %2882  ;;  %vm1933_vm5 = vweird.f32 %v3756_v54  ;;  %v1939_v27 = vand.u32 2147483648, %v3756_v54  ;;  %vm1470_vm7 = vmor %vm1468_vm0, %vm1469_vm4 }
 0x1af   : > { %v1921_v30 = vsel %vm1920_vm3, %v2875_v58, %v1917_v15  ;;  %v1487_v44 = vand.u32 2147483647, %v3762_v7  ;;  %vm1483_vm6 = vweird.f32 %v3762_v7  ;;  %v1489_v56 = vand.u32 2147483648, %v3762_v7 }
 0x1b0   : > { %v2885_v49 = vpop.eup %2884  ;;  %v1926_v59 = vsel %vm3770_vm15, %v1925_v55, %v1921_v30  ;;  %v1467_v50 = vadd.f32 %v2881_v0, %v1466_v60  ;;  %v3792_v9 = vadd.f32 1.0, %v2883_v24  ;;  %1043 = vmatmul.bf16.gmra.mxu3 %v815_v18  ;;  %v3803_v42 = vadd.f32 %v3732_v39, %v3665_v31 }
 0x1b1   : > { %v3783_v6 = vpop.f32.mrf.mxu3  ;;  %v2887_v34 = vpop.eup %2886  ;;  %v2313_v51 = vsel %vm1056_vm1, %v1926_v59, %v3627_v19  ;;  %v1929_v13 = vmul.f32 %v2885_v49, %v3756_v54  ;;  %v3807_v58 = vadd.f32 %v3732_v39, %v3673_v52  ;;  %vm3810_vm8 = vcmp.eq.f32.partialorder %v1937_v37, 8.507059e+37 }
 0x1b2   : > { %2377 = vst [vmem:[%s3293_s15 + $0x140] sm:$0xff] %v2313_v51  ;;  %v1471_v48 = vsel %vm1470_vm7, %v2881_v0, %v1467_v50  ;;  %v1479_v19 = vmul.f32 %v2887_v34, %v3762_v7  ;;  %2890 = vrcp.f32 %v3792_v9  ;;  %v1940_v36 = vor.u32 1.1754944e-38, %v1939_v27  ;;  %v638_v10 = vpop.f32.mrf.mxu0 }
 0x1b3   : > { %v2889_v33 = vpop.eup %2888  ;;  %v1476_v31 = vsel %vm3776_vm2, %v1475_v41, %v1471_v48  ;;  %v1930_v62 = vsub.f32 1.0, %v1929_v13  ;;  %vm3818_vm9 = vcmp.eq.f32.partialorder %v1487_v44, 8.507059e+37  ;;  %v637_v5 = vadd.f32 %v3558_v26, %v636_v22 }
 0x1b4   : > { %v3822_v11 = vpop.f32.mrf.mxu1  ;;  %v2283_v2 = vsel %vm1056_vm1, %v1476_v31, %v3636_v1  ;;  %v1480_v38 = vsub.f32 1.0, %v1479_v19  ;;  %v3827_v4 = vadd.f32 1.0, %v2889_v33  ;;  %vm1934_vm10 = vweird.f32 %v2885_v49 }
 0x1b5   : > { %2347 = vst [vmem:[%s3293_s15 + $0x50] sm:$0xff] %v2283_v2  ;;  %v1931_v53 = vmul.f32 %v2885_v49, %v1930_v62  ;;  %v2701_v8 = vmul.f32 -1.442695, %v3803_v42  ;;  %v2671_v35 = vmul.f32 -1.442695, %v3807_v58  ;;  %vm1484_vm11 = vweird.f32 %v2887_v34  ;;  %vm1935_vm12 = vmor %vm1933_vm5, %vm1934_vm10 }
 0x1b6   : > { %v1481_v0 = vmul.f32 %v2887_v34, %v1480_v38  ;;  %v1952_v61 = vand.u32 2147483647, %v3792_v9  ;;  %2892 = vrcp.f32 %v3827_v4  ;;  %v1490_v17 = vor.u32 1.1754944e-38, %v1489_v56  ;;  %vm1485_vm13 = vmor %vm1483_vm6, %vm1484_vm11 }
 0x1b7   : > { %v1932_v45 = vadd.f32 %v2885_v49, %v1931_v53  ;;  %2894 = vpow2.f32 %v2701_v8  ;;  %v3838_v16 = vadd.f32 %v3558_v26, %v716_v47  ;;  %v751_v22 = vmax.f32 %v637_v5, 0.0 }
 0x1b8   : > { %v2891_v28 = vpop.eup %2890  ;;  %v1482_v29 = vadd.f32 %v2887_v34, %v1481_v0  ;;  %2896 = vpow2.f32 %v2671_v35  ;;  %v639_v55 = vadd.f32 %v3558_v26, %v638_v10  ;;  %vm1948_vm14 = vweird.f32 %v3792_v9 }
 0x1b9   : > { %v3835_v1 = vpop.f32.mrf.mxu3  ;;  %v1936_v43 = vsel %vm1935_vm12, %v2885_v49, %v1932_v45  ;;  %v1944_v32 = vmul.f32 %v2891_v28, %v3792_v9  ;;  %v1954_v15 = vand.u32 2147483648, %v3792_v9  ;;  %vm3851_vm15 = vcmp.eq.f32.partialorder %v1952_v61, 8.507059e+37 }
 0x1ba   : > { %v1941_v54 = vsel %vm3810_vm8, %v1940_v36, %v1936_v43  ;;  %v1486_v41 = vsel %vm1485_vm13, %v2887_v34, %v1482_v29  ;;  %v752_v37 = vmax.f32 %v639_v55, 0.0  ;;  %v3862_v30 = vadd.f32 %v3732_v39, %v3703_v23 }
 0x1bb   : > { %v2314_v7 = vsel %vm1056_vm1, %v1941_v54, %v3689_v12  ;;  %v1491_v18 = vsel %vm3818_vm9, %v1490_v17, %v1486_v41  ;;  %v1945_v24 = vsub.f32 1.0, %v1944_v32  ;;  %v3870_v49 = vadd.f32 %v3732_v39, %v3720_v46 }
 0x1bc   : > { %v2893_v27 = vpop.eup %2892  ;;  %2378 = vst [vmem:[%s3293_s15 + $0x148] sm:$0xff] %v2314_v7  ;;  %v2284_v44 = vsel %vm1056_vm1, %v1491_v18, %v3694_v21  ;;  %v800_v47 = vpack.c.bf16 %v752_v37, %v751_v22  ;;  %v719_v12 = vadd.f32 %v3558_v26, %v718_v3  ;;  %vm1949_vm0 = vweird.f32 %v2891_v28  ;;  %v3876_v34 = vpop.f32.mrf.mxu1 }
 0x1bd   : > { %v2895_v59 = vpop.eup %2894  ;;  %2348 = vst [vmem:[%s3293_s15 + $0x58] sm:$0xff] %v2284_v44  ;;  %v1946_v50 = vmul.f32 %v2891_v28, %v1945_v24  ;;  %v1494_v23 = vmul.f32 %v2893_v27, %v3827_v4  ;;  %v2702_v56 = vmul.f32 -1.442695, %v3862_v30  ;;  %v1955_v13 = vor.u32 1.1754944e-38, %v1954_v15  ;;  %vm1950_vm2 = vmor %vm1948_vm14, %vm1949_vm0 }
 0x1be   : > { %v2897_v51 = vpop.eup %2896  ;;  %v1502_v21 = vand.u32 2147483647, %v3827_v4  ;;  %v3879_v48 = vadd.f32 1.0, %v2895_v59  ;;  %v2672_v46 = vmul.f32 -1.442695, %v3870_v49  ;;  %968 = vmatmul.bf16.gmra.mxu1 %v800_v47  ;;  %v1504_v33 = vand.u32 2147483648, %v3827_v4 }
 0x1bf   : > { %v1947_v26 = vadd.f32 %v2891_v28, %v1946_v50  ;;  %v1495_v40 = vsub.f32 1.0, %v1494_v23  ;;  %v3882_v19 = vadd.f32 1.0, %v2897_v51  ;;  %2898 = vpow2.f32 %v2702_v56 }
 0x1c0   : > { %2900 = vrcp.f32 %v3879_v48  ;;  %v784_v31 = vmax.f32 %v719_v12, 0.0  ;;  %v3890_v62 = vadd.f32 %v3732_v39, %v3748_v63  ;;  %vm1499_vm3 = vweird.f32 %v2893_v27 }
 0x1c1   : > { %v3892_v36 = vpop.f32.mrf.mxu3  ;;  %v1951_v52 = vsel %vm1950_vm2, %v2891_v28, %v1947_v26  ;;  %v1496_v2 = vmul.f32 %v2893_v27, %v1495_v40  ;;  %2902 = vrcp.f32 %v3882_v19  ;;  %v783_v38 = vmax.f32 %v3838_v16, 0.0 }
 0x1c2   : > { %v1956_v9 = vsel %vm3851_vm15, %v1955_v13, %v1951_v52  ;;  %vm1498_vm4 = vweird.f32 %v3827_v4  ;;  %2904 = vpow2.f32 %v2672_v46  ;;  %v1505_v63 = vor.u32 1.1754944e-38, %v1504_v33 }
 0x1c3   : > { %v2315_v5 = vsel %vm1056_vm1, %v1956_v9, %v3736_v57  ;;  %v1497_v53 = vadd.f32 %v2893_v27, %v1496_v2  ;;  %vm1500_vm5 = vmor %vm1498_vm4, %vm1499_vm3  ;;  %v816_v8 = vpack.c.bf16 %v784_v31, %v783_v38  ;;  %v2703_v35 = vmul.f32 -1.442695, %v3890_v62 }
 0x1c4   : > { %2379 = vst [vmem:[%s3293_s15 + $0x150] sm:$0xff] %v2315_v5  ;;  %v3906_v10 = vadd.f32 %v3732_v39, %v3768_v14  ;;  %vm1503_vm6 = vcmp.eq.f32.partialorder %v1502_v21, 8.507059e+37  ;;  %vm1963_vm7 = vweird.f32 %v3879_v48  ;;  %v3911_v57 = vadd.f32 %v3732_v39, %v3783_v6  ;;  %v3925_v55 = vpop.f32.mrf.mxu1 }
 0x1c5   : > { %v2899_v0 = vpop.eup %2898  ;;  %v1501_v61 = vsel %vm1500_vm5, %v2893_v27, %v1497_v53  ;;  %2906 = vpow2.f32 %v2703_v35  ;;  %1048 = vmatmul.bf16.gmra.mxu3 %v816_v8  ;;  %v3923_v6 = vadd.f32 %v3732_v39, %v3822_v11  ;;  %v1967_v43 = vand.u32 2147483647, %v3879_v48 }
 0x1c6   : > { %v2901_v4 = vpop.eup %2900  ;;  %v1506_v45 = vsel %vm1503_vm6, %v1505_v63, %v1501_v61  ;;  %v3913_v17 = vadd.f32 1.0, %v2899_v0  ;;  %v2673_v16 = vmul.f32 -1.442695, %v3906_v10  ;;  %v2704_v22 = vmul.f32 -1.442695, %v3911_v57 }
 0x1c7   : > { %v2903_v14 = vpop.eup %2902  ;;  %v2285_v28 = vsel %vm1056_vm1, %v1506_v45, %v3740_v25  ;;  %v1959_v29 = vmul.f32 %v2901_v4, %v3879_v48  ;;  %v1969_v32 = vand.u32 2147483648, %v3879_v48  ;;  %v1517_v54 = vand.u32 2147483647, %v3882_v19 }
 0x1c8   : > { %2349 = vst [vmem:[%s3293_s15 + $0x60] sm:$0xff] %v2285_v28  ;;  %v1509_v15 = vmul.f32 %v2903_v14, %v3882_v19  ;;  %2908 = vrcp.f32 %v3913_v17  ;;  %v2905_v25 = vpop.eup %2904  ;;  %v1519_v41 = vand.u32 2147483648, %v3882_v19  ;;  %vm1964_vm8 = vweird.f32 %v2901_v4 }
 0x1c9   : > { %v1960_v3 = vsub.f32 1.0, %v1959_v29  ;;  %2910 = vpow2.f32 %v2673_v16  ;;  %v3934_v60 = vadd.f32 1.0, %v2905_v25  ;;  %v3936_v37 = vpop.f32.mrf.mxu3  ;;  %v1982_v18 = vand.u32 2147483647, %v3913_v17  ;;  %vm1965_vm12 = vmor %vm1963_vm7, %vm1964_vm8 }
 0x1ca   : > { %v1510_v11 = vsub.f32 1.0, %v1509_v15  ;;  %2912 = vpow2.f32 %v2704_v22  ;;  %v1984_v24 = vand.u32 2147483648, %v3913_v17  ;;  %v2674_v27 = vmul.f32 -1.442695, %v3923_v6 }
 0x1cb   : > { %v1961_v7 = vmul.f32 %v2901_v4, %v1960_v3  ;;  %v2907_v44 = vpop.eup %2906  ;;  %vm1513_vm9 = vweird.f32 %v3882_v19  ;;  %vm1514_vm10 = vweird.f32 %v2903_v14  ;;  %2914 = vrcp.f32 %v3934_v60 }
 0x1cc   : > { %v1511_v47 = vmul.f32 %v2903_v14, %v1510_v11  ;;  %vm3943_vm11 = vcmp.eq.f32.partialorder %v1967_v43, 8.507059e+37  ;;  %v1970_v50 = vor.u32 1.1754944e-38, %v1969_v32  ;;  %v3947_v23 = vadd.f32 1.0, %v2907_v44  ;;  %vm1515_vm15 = vmor %vm1513_vm9, %vm1514_vm10  ;;  %v3977_v63 = vpop.f32.mrf.mxu1 }
 0x1cd   : > { %v1962_v12 = vadd.f32 %v2901_v4, %v1961_v7  ;;  %vm3952_vm13 = vcmp.eq.f32.partialorder %v1517_v54, 8.507059e+37  ;;  %v1520_v21 = vor.u32 1.1754944e-38, %v1519_v41  ;;  %vm1978_vm14 = vweird.f32 %v3913_v17 }
 0x1ce   : > { %v2909_v56 = vpop.eup %2908  ;;  %v1512_v51 = vadd.f32 %v2903_v14, %v1511_v47  ;;  %vm3960_vm0 = vcmp.eq.f32.partialorder %v1982_v18, 8.507059e+37  ;;  %v1985_v48 = vor.u32 1.1754944e-38, %v1984_v24  ;;  %2916 = vpow2.f32 %v2674_v27 }
 0x1cf   : > { %v2911_v46 = vpop.eup %2910  ;;  %v1966_v26 = vsel %vm1965_vm12, %v2901_v4, %v1962_v12  ;;  %v1974_v40 = vmul.f32 %v2909_v56, %v3913_v17  ;;  %v1532_v9 = vand.u32 2147483647, %v3934_v60  ;;  %2918 = vrcp.f32 %v3947_v23 }
 0x1d0   : > { %v2913_v31 = vpop.eup %2912  ;;  %v1971_v52 = vsel %vm3943_vm11, %v1970_v50, %v1966_v26  ;;  %v1516_v2 = vsel %vm1515_vm15, %v2903_v14, %v1512_v51  ;;  %v3975_v53 = vadd.f32 %v3732_v39, %v3835_v1  ;;  %v1534_v0 = vand.u32 2147483648, %v3934_v60 }
 0x1d1   : > { %v2316_v19 = vsel %vm1056_vm1, %v1971_v52, %v3803_v42  ;;  %v1521_v38 = vsel %vm3952_vm13, %v1520_v21, %v1516_v2  ;;  %v1975_v5 = vsub.f32 1.0, %v1974_v40  ;;  %v2915_v8 = vpop.eup %2914  ;;  %v3984_v61 = vadd.f32 1.0, %v2911_v46  ;;  %v3998_v14 = vpop.f32.mrf.mxu3 }
 0x1d2   : > { %2380 = vst [vmem:[%s3293_s15 + $0x158] sm:$0xff] %v2316_v19  ;;  %v2286_v35 = vsel %vm1056_vm1, %v1521_v38, %v3807_v58  ;;  %v3986_v42 = vadd.f32 1.0, %v2913_v31  ;;  %vm1979_vm2 = vweird.f32 %v2909_v56  ;;  %v1524_v1 = vmul.f32 %v2915_v8, %v3934_v60 }
 0x1d3   : > { %2350 = vst [vmem:[%s3293_s15 + $0x68] sm:$0xff] %v2286_v35  ;;  %v1976_v4 = vmul.f32 %v2909_v56, %v1975_v5  ;;  %v1997_v45 = vand.u32 2147483647, %v3947_v23  ;;  %vm1528_vm3 = vweird.f32 %v3934_v60  ;;  %vm3992_vm4 = vcmp.eq.f32.partialorder %v1532_v9, 8.507059e+37  ;;  %vm1980_vm5 = vmor %vm1978_vm14, %vm1979_vm2 }
 0x1d4   : > { %v1999_v58 = vand.u32 2147483648, %v3947_v23  ;;  %2920 = vrcp.f32 %v3984_v61  ;;  %v2917_v28 = vpop.eup %2916  ;;  %v1525_v22 = vsub.f32 1.0, %v1524_v1  ;;  %v2705_v43 = vmul.f32 -1.442695, %v3975_v53 }
 0x1d5   : > { %v1977_v29 = vadd.f32 %v2909_v56, %v1976_v4  ;;  %2922 = vrcp.f32 %v3986_v42  ;;  %v2919_v32 = vpop.eup %2918  ;;  %vm1529_vm6 = vweird.f32 %v2915_v8  ;;  %v1535_v15 = vor.u32 1.1754944e-38, %v1534_v0  ;;  %v4038_v60 = vpop.f32.mrf.mxu1 }
 0x1d6   : > { %vm1993_vm7 = vweird.f32 %v3947_v23  ;;  %v4007_v25 = vadd.f32 %v3732_v39, %v3876_v34  ;;  %v1526_v54 = vmul.f32 %v2915_v8, %v1525_v22  ;;  %v1989_v41 = vmul.f32 %v2919_v32, %v3947_v23  ;;  %vm1530_vm10 = vmor %vm1528_vm3, %vm1529_vm6 }
 0x1d7   : > { %v1981_v3 = vsel %vm1980_vm5, %v2909_v56, %v1977_v29  ;;  %vm4010_vm8 = vcmp.eq.f32.partialorder %v1997_v45, 8.507059e+37  ;;  %v2000_v7 = vor.u32 1.1754944e-38, %v1999_v58  ;;  %v1547_v18 = vand.u32 2147483647, %v3984_v61 }
 0x1d8   : > { %v1986_v17 = vsel %vm3960_vm0, %v1985_v48, %v1981_v3  ;;  %v1549_v24 = vand.u32 2147483648, %v3984_v61  ;;  %v1527_v27 = vadd.f32 %v2915_v8, %v1526_v54  ;;  %v1990_v44 = vsub.f32 1.0, %v1989_v41 }
 0x1d9   : > { %v2317_v34 = vsel %vm1056_vm1, %v1986_v17, %v3862_v30  ;;  %vm1543_vm9 = vweird.f32 %v3984_v61  ;;  %v4022_v47 = vadd.f32 1.0, %v2917_v28  ;;  %vm1994_vm11 = vweird.f32 %v2919_v32  ;;  %v4057_v52 = vpop.f32.mrf.mxu3 }
 0x1da   : > { %v2921_v12 = vpop.eup %2920  ;;  %2381 = vst [vmem:[%s3293_s15 + $0x160] sm:$0xff] %v2317_v34  ;;  %2924 = vpow2.f32 %v2705_v43  ;;  %v2675_v59 = vmul.f32 -1.442695, %v4007_v25  ;;  %v4031_v30 = vadd.f32 %v3732_v39, %v3892_v36  ;;  %v1531_v56 = vsel %vm1530_vm10, %v2915_v8, %v1527_v27  ;;  %vm1995_vm14 = vmor %vm1993_vm7, %vm1994_vm11 }
 0x1db   : > { %v2923_v50 = vpop.eup %2922  ;;  %v1991_v51 = vmul.f32 %v2919_v32, %v1990_v44  ;;  %v1539_v13 = vmul.f32 %v2921_v12, %v3984_v61  ;;  %v4036_v21 = vadd.f32 %v3732_v39, %v3925_v55  ;;  %v1536_v46 = vsel %vm3992_vm4, %v1535_v15, %v1531_v56 }
 0x1dc   : > { %vm4042_vm12 = vcmp.eq.f32.partialorder %v1547_v18, 8.507059e+37  ;;  %v2004_v36 = vmul.f32 %v2923_v50, %v3986_v42  ;;  %2926 = vrcp.f32 %v4022_v47  ;;  %v2287_v40 = vsel %vm1056_vm1, %v1536_v46, %v3870_v49 }
 0x1dd   : > { %v1992_v33 = vadd.f32 %v2919_v32, %v1991_v51  ;;  %v1540_v55 = vsub.f32 1.0, %v1539_v13  ;;  %vm2008_vm13 = vweird.f32 %v3986_v42  ;;  %2351 = vst [vmem:[%s3293_s15 + $0x70] sm:$0xff] %v2287_v40  ;;  %vm1544_vm15 = vweird.f32 %v2921_v12  ;;  %v4088_v54 = vpop.f32.mrf.mxu1 }
 0x1de   : > { %v2005_v48 = vsub.f32 1.0, %v2004_v36  ;;  %v2014_v31 = vand.u32 2147483648, %v3986_v42  ;;  %2928 = vpow2.f32 %v2675_v59  ;;  %v2706_v49 = vmul.f32 -1.442695, %v4031_v30  ;;  %vm1545_vm2 = vmor %vm1543_vm9, %vm1544_vm15 }
 0x1df   : > { %v1996_v2 = vsel %vm1995_vm14, %v2919_v32, %v1992_v33  ;;  %v1541_v9 = vmul.f32 %v2921_v12, %v1540_v55  ;;  %v2676_v19 = vmul.f32 -1.442695, %v4036_v21  ;;  %vm2009_vm0 = vweird.f32 %v2923_v50 }
 0x1e0   : > { %v2925_v38 = vpop.eup %2924  ;;  %v2001_v5 = vsel %vm4010_vm8, %v2000_v7, %v1996_v2  ;;  %v2006_v23 = vmul.f32 %v2923_v50, %v2005_v48  ;;  %v2012_v8 = vand.u32 2147483647, %v3986_v42  ;;  %2930 = vpow2.f32 %v2706_v49  ;;  %vm2010_vm3 = vmor %vm2008_vm13, %vm2009_vm0 }
 0x1e1   : > { %v2318_v35 = vsel %vm1056_vm1, %v2001_v5, %v3890_v62  ;;  %v1542_v0 = vadd.f32 %v2921_v12, %v1541_v9  ;;  %v4067_v4 = vadd.f32 1.0, %v2925_v38  ;;  %v1550_v45 = vor.u32 1.1754944e-38, %v1549_v24  ;;  %v4110_v44 = vpop.f32.mrf.mxu3 }
 0x1e2   : > { %v2927_v1 = vpop.eup %2926  ;;  %2382 = vst [vmem:[%s3293_s15 + $0x168] sm:$0xff] %v2318_v35  ;;  %v2007_v16 = vadd.f32 %v2923_v50, %v2006_v23  ;;  %2932 = vpow2.f32 %v2676_v19  ;;  %v4075_v58 = vadd.f32 %v3732_v39, %v3936_v37  ;;  %v2015_v62 = vor.u32 1.1754944e-38, %v2014_v31 }
 0x1e3   : > { %v1546_v28 = vsel %vm1545_vm2, %v2921_v12, %v1542_v0  ;;  %v1554_v29 = vmul.f32 %v2927_v1, %v4022_v47  ;;  %2934 = vrcp.f32 %v4067_v4  ;;  %vm2013_vm4 = vcmp.eq.f32.partialorder %v2012_v8, 8.507059e+37 }
 0x1e4   : > { %v2929_v22 = vpop.eup %2928  ;;  %v1551_v61 = vsel %vm4042_vm12, %v1550_v45, %v1546_v28  ;;  %v2011_v43 = vsel %vm2010_vm3, %v2923_v50, %v2007_v16  ;;  %v1562_v37 = vand.u32 2147483647, %v4022_v47  ;;  %v1564_v3 = vand.u32 2147483648, %v4022_v47 }
 0x1e5   : > { %v2288_v32 = vsel %vm1056_vm1, %v1551_v61, %v3906_v10  ;;  %v2016_v42 = vsel %vm2013_vm4, %v2015_v62, %v2011_v43  ;;  %v1555_v15 = vsub.f32 1.0, %v1554_v29  ;;  %v4094_v11 = vadd.f32 1.0, %v2929_v22 }
 0x1e6   : > { %2352 = vst [vmem:[%s3293_s15 + $0x78] sm:$0xff] %v2288_v32  ;;  %v2319_v41 = vsel %vm1056_vm1, %v2016_v42, %v3911_v57  ;;  %v2707_v17 = vmul.f32 -1.442695, %v4075_v58  ;;  %v4099_v7 = vadd.f32 %v3732_v39, %v3977_v63  ;;  %v2931_v10 = vpop.eup %2930  ;;  %vm1558_vm5 = vweird.f32 %v4022_v47 }
 0x1e7   : > { %2383 = vst [vmem:[%s3293_s15 + $0x170] sm:$0xff] %v2319_v41  ;;  %v1556_v18 = vmul.f32 %v2927_v1, %v1555_v15  ;;  %vm1559_vm6 = vweird.f32 %v2927_v1  ;;  %vm4103_vm7 = vcmp.eq.f32.partialorder %v1562_v37, 8.507059e+37  ;;  %v2027_v57 = vand.u32 2147483647, %v4067_v4 }
 0x1e8   : > { %v2933_v24 = vpop.eup %2932  ;;  %v2029_v27 = vand.u32 2147483648, %v4067_v4  ;;  %2936 = vrcp.f32 %v4094_v11  ;;  %v4112_v59 = vadd.f32 1.0, %v2931_v10  ;;  %vm1560_vm8 = vmor %vm1558_vm5, %vm1559_vm6  ;;  %v1565_v47 = vor.u32 1.1754944e-38, %v1564_v3 }
 0x1e9   : > { %v2935_v63 = vpop.eup %2934  ;;  %v1557_v12 = vadd.f32 %v2927_v1, %v1556_v18  ;;  %v4114_v50 = vadd.f32 1.0, %v2933_v24  ;;  %2938 = vpow2.f32 %v2707_v17  ;;  %v2677_v51 = vmul.f32 -1.442695, %v4099_v7 }
 0x1ea   : > { %v2019_v56 = vmul.f32 %v2935_v63, %v4067_v4  ;;  %v4120_v13 = vadd.f32 %v3732_v39, %v3998_v14  ;;  %v1577_v26 = vand.u32 2147483647, %v4094_v11  ;;  %v1579_v36 = vand.u32 2147483648, %v4094_v11 }
 0x1eb   : > { %v1561_v46 = vsel %vm1560_vm8, %v2927_v1, %v1557_v12  ;;  %2940 = vrcp.f32 %v4112_v59  ;;  %vm2023_vm9 = vweird.f32 %v4067_v4  ;;  %vm4132_vm10 = vcmp.eq.f32.partialorder %v2027_v57, 8.507059e+37  ;;  %v4145_v23 = vpop.f32.mrf.mxu1  ;;  %v4161_v4 = vpop.f32.mrf.mxu3 }
 0x1ec   : > { %v1566_v40 = vsel %vm4103_vm7, %v1565_v47, %v1561_v46  ;;  %v2020_v33 = vsub.f32 1.0, %v2019_v56  ;;  %2942 = vrcp.f32 %v4114_v50  ;;  %v2030_v48 = vor.u32 1.1754944e-38, %v2029_v27 }
 0x1ed   : > { %v2289_v14 = vsel %vm1056_vm1, %v1566_v40, %v3923_v6  ;;  %vm1573_vm11 = vweird.f32 %v4094_v11  ;;  %vm2024_vm12 = vweird.f32 %v2935_v63  ;;  %v2042_v9 = vand.u32 2147483647, %v4112_v59 }
 0x1ee   : > { %v2937_v31 = vpop.eup %2936  ;;  %2353 = vst [vmem:[%s3293_s15 + $0x80] sm:$0xff] %v2289_v14  ;;  %v2021_v2 = vmul.f32 %v2935_v63, %v2020_v33  ;;  %2944 = vpow2.f32 %v2677_v51  ;;  %vm4140_vm13 = vcmp.eq.f32.partialorder %v1577_v26, 8.507059e+37  ;;  %v1580_v6 = vor.u32 1.1754944e-38, %v1579_v36  ;;  %vm2025_vm15 = vmor %vm2023_vm9, %vm2024_vm12 }
 0x1ef   : > { %v2939_v49 = vpop.eup %2938  ;;  %v1569_v19 = vmul.f32 %v2937_v31, %v4094_v11  ;;  %v2708_v5 = vmul.f32 -1.442695, %v4120_v13  ;;  %vm2038_vm14 = vweird.f32 %v4112_v59  ;;  %v2044_v35 = vand.u32 2147483648, %v4112_v59 }
 0x1f0   : > { %v2022_v8 = vadd.f32 %v2935_v63, %v2021_v2  ;;  %v4149_v0 = vadd.f32 1.0, %v2939_v49  ;;  %vm1588_vm0 = vweird.f32 %v4114_v50  ;;  %v1592_v16 = vand.u32 2147483647, %v4114_v50 }
 0x1f1   : > { %v2941_v1 = vpop.eup %2940  ;;  %v1570_v45 = vsub.f32 1.0, %v1569_v19  ;;  %2946 = vpow2.f32 %v2708_v5  ;;  %vm1574_vm2 = vweird.f32 %v2937_v31  ;;  %vm4156_vm3 = vcmp.eq.f32.partialorder %v2042_v9, 8.507059e+37 }
 0x1f2   : > { %v2943_v28 = vpop.eup %2942  ;;  %v2026_v62 = vsel %vm2025_vm15, %v2935_v63, %v2022_v8  ;;  %v2034_v29 = vmul.f32 %v2941_v1, %v4112_v59  ;;  %2948 = vrcp.f32 %v4149_v0  ;;  %v4168_v32 = vadd.f32 %v3732_v39, %v4038_v60  ;;  %vm1575_vm5 = vmor %vm1573_vm11, %vm1574_vm2 }
 0x1f3   : > { %v2031_v61 = vsel %vm4132_vm10, %v2030_v48, %v2026_v62  ;;  %v1571_v43 = vmul.f32 %v2937_v31, %v1570_v45  ;;  %v1584_v37 = vmul.f32 %v2943_v28, %v4114_v50  ;;  %v2045_v41 = vor.u32 1.1754944e-38, %v2044_v35  ;;  %v951_v33 = vpop.f32.mrf.mxu1 }
 0x1f4   : > { %v2945_v42 = vpop.eup %2944  ;;  %v2320_v15 = vsel %vm1056_vm1, %v2031_v61, %v3975_v53  ;;  %v2035_v3 = vsub.f32 1.0, %v2034_v29  ;;  %v1594_v17 = vand.u32 2147483648, %v4114_v50  ;;  %vm4175_vm4 = vcmp.eq.f32.partialorder %v1592_v16, 8.507059e+37 }
 0x1f5   : > { %2384 = vst [vmem:[%s3293_s15 + $0x178] sm:$0xff] %v2320_v15  ;;  %v1572_v10 = vadd.f32 %v2937_v31, %v1571_v43  ;;  %v1585_v18 = vsub.f32 1.0, %v1584_v37  ;;  %v4179_v34 = vadd.f32 1.0, %v2945_v42  ;;  %vm2039_vm6 = vweird.f32 %v2941_v1 }
 0x1f6   : > { %v2036_v60 = vmul.f32 %v2941_v1, %v2035_v3  ;;  %vm1589_vm7 = vweird.f32 %v2943_v28  ;;  %v4186_v53 = vadd.f32 %v3732_v39, %v4057_v52  ;;  %v2678_v12 = vmul.f32 -1.442695, %v4168_v32  ;;  %vm2040_vm8 = vmor %vm2038_vm14, %vm2039_vm6  ;;  %v4220_v9 = vpop.f32.mrf.mxu3 }
 0x1f7   : > { %v2947_v57 = vpop.eup %2946  ;;  %v1576_v27 = vsel %vm1575_vm5, %v2937_v31, %v1572_v10  ;;  %v1586_v63 = vmul.f32 %v2943_v28, %v1585_v18  ;;  %2950 = vrcp.f32 %v4179_v34  ;;  %v1595_v51 = vor.u32 1.1754944e-38, %v1594_v17  ;;  %vm1590_vm9 = vmor %vm1588_vm0, %vm1589_vm7 }
 0x1f8   : > { %v2949_v47 = vpop.eup %2948  ;;  %v1581_v11 = vsel %vm4140_vm13, %v1580_v6, %v1576_v27  ;;  %v2037_v56 = vadd.f32 %v2941_v1, %v2036_v60  ;;  %v4194_v46 = vadd.f32 %v3732_v39, %v4088_v54  ;;  %v2057_v40 = vand.u32 2147483647, %v4149_v0 }
 0x1f9   : > { %v2290_v52 = vsel %vm1056_vm1, %v1581_v11, %v4007_v25  ;;  %v1587_v26 = vadd.f32 %v2943_v28, %v1586_v63  ;;  %v2049_v36 = vmul.f32 %v2949_v47, %v4149_v0  ;;  %v2059_v54 = vand.u32 2147483648, %v4149_v0 }
 0x1fa   : > { %2354 = vst [vmem:[%s3293_s15 + $0x88] sm:$0xff] %v2290_v52  ;;  %v2041_v14 = vsel %vm2040_vm8, %v2941_v1, %v2037_v56  ;;  %v4208_v55 = vadd.f32 1.0, %v2947_v57  ;;  %v2709_v25 = vmul.f32 -1.442695, %v4186_v53  ;;  %2952 = vpow2.f32 %v2678_v12 }
 0x1fb   : > { %v2046_v59 = vsel %vm4156_vm3, %v2045_v41, %v2041_v14  ;;  %v1591_v48 = vsel %vm1590_vm9, %v2943_v28, %v1587_v26  ;;  %v2050_v31 = vsub.f32 1.0, %v2049_v36  ;;  %vm2053_vm10 = vweird.f32 %v4149_v0 }
 0x1fc   : > { %v2321_v2 = vsel %vm1056_vm1, %v2046_v59, %v4031_v30  ;;  %v1596_v50 = vsel %vm4175_vm4, %v1595_v51, %v1591_v48  ;;  %2954 = vrcp.f32 %v4208_v55  ;;  %vm2054_vm11 = vweird.f32 %v2949_v47 }
 0x1fd   : > { %v2951_v49 = vpop.eup %2950  ;;  %2385 = vst [vmem:[%s3293_s15 + $0x180] sm:$0xff] %v2321_v2  ;;  %v2291_v19 = vsel %vm1056_vm1, %v1596_v50, %v4036_v21  ;;  %v2051_v38 = vmul.f32 %v2949_v47, %v2050_v31  ;;  %vm4226_vm12 = vcmp.eq.f32.partialorder %v2057_v40, 8.507059e+37  ;;  %v2060_v30 = vor.u32 1.1754944e-38, %v2059_v54  ;;  %vm2055_vm14 = vmor %vm2053_vm10, %vm2054_vm11 }
 0x1fe   : > { %2355 = vst [vmem:[%s3293_s15 + $0x90] sm:$0xff] %v2291_v19  ;;  %v1599_v5 = vmul.f32 %v2951_v49, %v4179_v34  ;;  %vm1603_vm13 = vweird.f32 %v4179_v34  ;;  %2956 = vpow2.f32 %v2709_v25  ;;  %v1607_v35 = vand.u32 2147483647, %v4179_v34  ;;  %v4264_v3 = vpop.f32.mrf.mxu1  ;;  %v4279_v12 = vpop.f32.mrf.mxu3 }
 0x1ff   : > { %v2052_v8 = vadd.f32 %v2949_v47, %v2051_v38  ;;  %v2679_v1 = vmul.f32 -1.442695, %v4194_v46  ;;  %v4237_v21 = vadd.f32 %v3732_v39, %v4110_v44  ;;  %vm1604_vm15 = vweird.f32 %v2951_v49 }
 0x200   : > { %v1600_v45 = vsub.f32 1.0, %v1599_v5  ;;  %v1609_v16 = vand.u32 2147483648, %v4179_v34  ;;  %v4244_v28 = vadd.f32 %v3732_v39, %v4145_v23  ;;  %v2953_v62 = vpop.eup %2952  ;;  %v4249_v44 = vadd.f32 %v3732_v39, %v4161_v4  ;;  %vm1605_vm2 = vmor %vm1603_vm13, %vm1604_vm15 }
 0x201   : > { %v2056_v29 = vsel %vm2055_vm14, %v2949_v47, %v2052_v8  ;;  %2958 = vpow2.f32 %v2679_v1  ;;  %v2710_v22 = vmul.f32 -1.442695, %v4237_v21  ;;  %v4253_v37 = vadd.f32 1.0, %v2953_v62 }
 0x202   : > { %v2955_v0 = vpop.eup %2954  ;;  %v2061_v61 = vsel %vm4226_vm12, %v2060_v30, %v2056_v29  ;;  %v1601_v43 = vmul.f32 %v2951_v49, %v1600_v45  ;;  %v2680_v23 = vmul.f32 -1.442695, %v4244_v28  ;;  %vm4259_vm0 = vcmp.eq.f32.partialorder %v1607_v35, 8.507059e+37  ;;  %v4320_v30 = vld [vmem:[%s4816_s4] ss:$0 sm:$0xff] }
 0x203   : > { %v2322_v42 = vsel %vm1056_vm1, %v2061_v61, %v4075_v58  ;;  %v2064_v4 = vmul.f32 %v2955_v0, %v4208_v55  ;;  %2960 = vpow2.f32 %v2710_v22  ;;  %v1610_v10 = vor.u32 1.1754944e-38, %v1609_v16 }
 0x204   : > { %v2957_v41 = vpop.eup %2956  ;;  %2386 = vst [vmem:[%s3293_s15 + $0x188] sm:$0xff] %v2322_v42  ;;  %v1602_v17 = vadd.f32 %v2951_v49, %v1601_v43  ;;  %v2072_v18 = vand.u32 2147483647, %v4208_v55  ;;  %2962 = vrcp.f32 %v4253_v37  ;;  %v2074_v24 = vand.u32 2147483648, %v4208_v55 }
 0x205   : > { %v2065_v58 = vsub.f32 1.0, %v2064_v4  ;;  %v4273_v60 = vadd.f32 1.0, %v2957_v41  ;;  %v4276_v57 = vadd.f32 %v3732_v39, %v951_v33  ;;  %vm2069_vm3 = vweird.f32 %v2955_v0 }
 0x206   : > { %v1606_v27 = vsel %vm1605_vm2, %v2951_v49, %v1602_v17  ;;  %2964 = vpow2.f32 %v2680_v23  ;;  %v2711_v63 = vmul.f32 -1.442695, %v4249_v44  ;;  %v1622_v56 = vand.u32 2147483647, %v4253_v37  ;;  %v4326_v8 = vpop.f32.mrf.mxu1 }
 0x207   : > { %v2959_v47 = vpop.eup %2958  ;;  %v1611_v34 = vsel %vm4259_vm0, %v1610_v10, %v1606_v27  ;;  %v2066_v11 = vmul.f32 %v2955_v0, %v2065_v58  ;;  %2966 = vrcp.f32 %v4273_v60  ;;  %vm2068_vm4 = vweird.f32 %v4208_v55 }
 0x208   : > { %v2292_v39 = vsel %vm1056_vm1, %v1611_v34, %v4099_v7  ;;  %vm4289_vm5 = vcmp.eq.f32.partialorder %v2072_v18, 8.507059e+37  ;;  %v1624_v52 = vand.u32 2147483648, %v4253_v37  ;;  %v2075_v40 = vor.u32 1.1754944e-38, %v2074_v24  ;;  %vm2070_vm6 = vmor %vm2068_vm4, %vm2069_vm3 }
 0x209   : > { %v2961_v26 = vpop.eup %2960  ;;  %2356 = vst [vmem:[%s3293_s15 + $0x98] sm:$0xff] %v2292_v39  ;;  %v2067_v36 = vadd.f32 %v2955_v0, %v2066_v11  ;;  %v4295_v33 = vadd.f32 1.0, %v2959_v47  ;;  %2968 = vpow2.f32 %v2711_v63  ;;  %vm1618_vm7 = vweird.f32 %v4253_v37 }
 0x20a   : > { %v2963_v14 = vpop.eup %2962  ;;  %v2087_v7 = vand.u32 2147483647, %v4273_v60  ;;  %v4300_v54 = vadd.f32 1.0, %v2961_v26  ;;  %v2681_v55 = vmul.f32 -1.442695, %v4276_v57  ;;  %vm4304_vm8 = vcmp.eq.f32.partialorder %v1622_v56, 8.507059e+37 }
 0x20b   : > { %v2071_v25 = vsel %vm2070_vm6, %v2955_v0, %v2067_v36  ;;  %v1614_v59 = vmul.f32 %v2963_v14, %v4253_v37  ;;  %2970 = vrcp.f32 %v4295_v33  ;;  %v1625_v50 = vor.u32 1.1754944e-38, %v1624_v52  ;;  %v4342_v23 = vpop.f32.mrf.mxu3 }
 0x20c   : > { %v2965_v31 = vpop.eup %2964  ;;  %v2076_v2 = vsel %vm4289_vm5, %v2075_v40, %v2071_v25  ;;  %vm2083_vm9 = vweird.f32 %v4273_v60  ;;  %v2089_v49 = vand.u32 2147483648, %v4273_v60  ;;  %2972 = vrcp.f32 %v4300_v54 }
 0x20d   : > { %v2967_v19 = vpop.eup %2966  ;;  %v2323_v38 = vsel %vm1056_vm1, %v2076_v2, %v4120_v13  ;;  %v1615_v6 = vsub.f32 1.0, %v1614_v59  ;;  %v4324_v5 = vadd.f32 %v4320_v30, %v4220_v9  ;;  %vm4330_vm10 = vcmp.eq.f32.partialorder %v2087_v7, 8.507059e+37 }
 0x20e   : > { %2387 = vst [vmem:[%s3293_s15 + $0x190] sm:$0xff] %v2323_v38  ;;  %v2079_v35 = vmul.f32 %v2967_v19, %v4273_v60  ;;  %v1637_v13 = vand.u32 2147483647, %v4295_v33  ;;  %v1639_v45 = vand.u32 2147483648, %v4295_v33  ;;  %2974 = vpow2.f32 %v2681_v55 }
 0x20f   : > { %v2969_v16 = vpop.eup %2968  ;;  %v1616_v62 = vmul.f32 %v2963_v14, %v1615_v6  ;;  %vm1619_vm11 = vweird.f32 %v2963_v14  ;;  %v2104_v9 = vand.u32 2147483648, %v4300_v54  ;;  %v4337_v29 = vadd.f32 1.0, %v2965_v31 }
 0x210   : > { %v2080_v22 = vsub.f32 1.0, %v2079_v35  ;;  %v2090_v0 = vor.u32 1.1754944e-38, %v2089_v49  ;;  %v2102_v61 = vand.u32 2147483647, %v4300_v54  ;;  %v4340_v43 = vadd.f32 1.0, %v2969_v16  ;;  %vm1620_vm14 = vmor %vm1618_vm7, %vm1619_vm11 }
 0x211   : > { %v2971_v42 = vpop.eup %2970  ;;  %v1617_v15 = vadd.f32 %v2963_v14, %v1616_v62  ;;  %vm2084_vm12 = vweird.f32 %v2967_v19  ;;  %vm1633_vm13 = vweird.f32 %v4295_v33  ;;  %2976 = vrcp.f32 %v4337_v29  ;;  %v959_v25 = vpop.f32.mrf.mxu1 }
 0x212   : > { %v2081_v4 = vmul.f32 %v2967_v19, %v2080_v22  ;;  %v1629_v41 = vmul.f32 %v2971_v42, %v4295_v33  ;;  %vm4349_vm15 = vcmp.eq.f32.partialorder %v1637_v13, 8.507059e+37  ;;  %v1640_v10 = vor.u32 1.1754944e-38, %v1639_v45  ;;  %v2973_v58 = vpop.eup %2972  ;;  %vm2085_vm3 = vmor %vm2083_vm9, %vm2084_vm12 }
 0x213   : > { %vm2098_vm0 = vweird.f32 %v4300_v54  ;;  %v2712_v18 = vmul.f32 -1.442695, %v4324_v5  ;;  %v1621_v24 = vsel %vm1620_vm14, %v2963_v14, %v1617_v15  ;;  %v2105_v27 = vor.u32 1.1754944e-38, %v2104_v9  ;;  %v1036_v1 = vpop.f32.mrf.mxu3 }
 0x214   : > { %2978 = vrcp.f32 %v4340_v43  ;;  %v4358_v37 = vadd.f32 %v4320_v30, %v4264_v3  ;;  %v2975_v63 = vpop.eup %2974  ;;  %v1626_v47 = vsel %vm4304_vm8, %v1625_v50, %v1621_v24  ;;  %v2082_v34 = vadd.f32 %v2967_v19, %v2081_v4 }
 0x215   : > { %v1630_v11 = vsub.f32 1.0, %v1629_v41  ;;  %v2094_v56 = vmul.f32 %v2973_v58, %v4300_v54  ;;  %vm4363_vm2 = vcmp.eq.f32.partialorder %v2102_v61, 8.507059e+37  ;;  %v2293_v51 = vsel %vm1056_vm1, %v1626_v47, %v4168_v32 }
 0x216   : > { %vm1634_vm4 = vweird.f32 %v2971_v42  ;;  %v1652_v3 = vand.u32 2147483647, %v4337_v29  ;;  %v1654_v52 = vand.u32 2147483648, %v4337_v29  ;;  %2357 = vst [vmem:[%s3293_s15 + $0xa0] sm:$0xff] %v2293_v51  ;;  %v2086_v26 = vsel %vm2085_vm3, %v2967_v19, %v2082_v34 }
 0x217   : > { %v1631_v36 = vmul.f32 %v2971_v42, %v1630_v11  ;;  %v2095_v40 = vsub.f32 1.0, %v2094_v56  ;;  %vm2099_vm5 = vweird.f32 %v2973_v58  ;;  %vm1648_vm6 = vweird.f32 %v4337_v29  ;;  %v2977_v14 = vpop.eup %2976  ;;  %vm1635_vm7 = vmor %vm1633_vm13, %vm1634_vm4 }
 0x218   : > { %v2091_v32 = vsel %vm4330_vm10, %v2090_v0, %v2086_v26  ;;  %v2117_v60 = vand.u32 2147483647, %v4340_v43  ;;  %v2119_v7 = vand.u32 2147483648, %v4340_v43  ;;  %v4381_v55 = vadd.f32 1.0, %v2975_v63  ;;  %vm2100_vm10 = vmor %vm2098_vm0, %vm2099_vm5 }
 0x219   : > { %v2324_v59 = vsel %vm1056_vm1, %v2091_v32, %v4186_v53  ;;  %v1632_v48 = vadd.f32 %v2971_v42, %v1631_v36  ;;  %v2096_v31 = vmul.f32 %v2973_v58, %v2095_v40  ;;  %v1644_v2 = vmul.f32 %v2977_v14, %v4337_v29 }
 0x21a   : > { %v2979_v50 = vpop.eup %2978  ;;  %2388 = vst [vmem:[%s3293_s15 + $0x198] sm:$0xff] %v2324_v59  ;;  %vm4391_vm8 = vcmp.eq.f32.partialorder %v1652_v3, 8.507059e+37  ;;  %v1655_v19 = vor.u32 1.1754944e-38, %v1654_v52  ;;  %vm2113_vm9 = vweird.f32 %v4340_v43  ;;  %2980 = vrcp.f32 %v4381_v55 }
 0x21b   : > { %v1636_v53 = vsel %vm1635_vm7, %v2971_v42, %v1632_v48  ;;  %v2097_v38 = vadd.f32 %v2973_v58, %v2096_v31  ;;  %v1645_v6 = vsub.f32 1.0, %v1644_v2  ;;  %v2109_v35 = vmul.f32 %v2979_v50, %v4340_v43 }
 0x21c   : > { %v1641_v33 = vsel %vm4349_vm15, %v1640_v10, %v1636_v53  ;;  %vm1649_vm11 = vweird.f32 %v2977_v14  ;;  %vm4403_vm12 = vcmp.eq.f32.partialorder %v2117_v60, 8.507059e+37  ;;  %v2120_v45 = vor.u32 1.1754944e-38, %v2119_v7 }
 0x21d   : > { %v2294_v16 = vsel %vm1056_vm1, %v1641_v33, %v4194_v46  ;;  %v2101_v62 = vsel %vm2100_vm10, %v2973_v58, %v2097_v38  ;;  %v1646_v9 = vmul.f32 %v2977_v14, %v1645_v6  ;;  %v2110_v22 = vsub.f32 1.0, %v2109_v35  ;;  %vm1650_vm14 = vmor %vm1648_vm6, %vm1649_vm11 }
 0x21e   : > { %2358 = vst [vmem:[%s3293_s15 + $0xa8] sm:$0xff] %v2294_v16  ;;  %v2106_v0 = vsel %vm4363_vm2, %v2105_v27, %v2101_v62  ;;  %vm2114_vm13 = vweird.f32 %v2979_v50  ;;  %v1667_v54 = vand.u32 2147483647, %v4381_v55  ;;  %2982 = vpow2.f32 %v2712_v18 }
 0x21f   : > { %v2325_v61 = vsel %vm1056_vm1, %v2106_v0, %v4237_v21  ;;  %v1647_v42 = vadd.f32 %v2977_v14, %v1646_v9  ;;  %v2111_v15 = vmul.f32 %v2979_v50, %v2110_v22  ;;  %v2682_v4 = vmul.f32 -1.442695, %v4358_v37  ;;  %vm2115_vm0 = vmor %vm2113_vm9, %vm2114_vm13  ;;  %v1039_v52 = vpop.f32.mrf.mxu3 }
 0x220   : > { %v2981_v46 = vpop.eup %2980  ;;  %2389 = vst [vmem:[%s3293_s15 + $0x1a0] sm:$0xff] %v2325_v61  ;;  %v1669_v41 = vand.u32 2147483648, %v4381_v55  ;;  %v4425_v17 = vadd.f32 %v4320_v30, %v4279_v12  ;;  %v4429_v10 = vadd.f32 %v4320_v30, %v4326_v8  ;;  %v4433_v21 = vadd.f32 %v4320_v30, %v4342_v23  ;;  %v961_v23 = vpop.f32.mrf.mxu1 }
 0x221   : > { %v1651_v18 = vsel %vm1650_vm14, %v2977_v14, %v1647_v42  ;;  %v2112_v58 = vadd.f32 %v2979_v50, %v2111_v15  ;;  %v1659_v29 = vmul.f32 %v2981_v46, %v4381_v55  ;;  %vm1664_vm15 = vweird.f32 %v2981_v46 }
 0x222   : > { %v1656_v24 = vsel %vm4391_vm8, %v1655_v19, %v1651_v18  ;;  %2984 = vpow2.f32 %v2682_v4  ;;  %v2713_v12 = vmul.f32 -1.442695, %v4425_v17  ;;  %v2683_v8 = vmul.f32 -1.442695, %v4429_v10 }
 0x223   : > { %v2295_v27 = vsel %vm1056_vm1, %v1656_v24, %v4244_v28  ;;  %v2116_v63 = vsel %vm2115_vm0, %v2979_v50, %v2112_v58  ;;  %v1660_v47 = vsub.f32 1.0, %v1659_v29  ;;  %v2714_v34 = vmul.f32 -1.442695, %v4433_v21 }
 0x224   : > { %v2983_v11 = vpop.eup %2982  ;;  %2359 = vst [vmem:[%s3293_s15 + $0xb0] sm:$0xff] %v2295_v27  ;;  %v2121_v43 = vsel %vm4403_vm12, %v2120_v45, %v2116_v63  ;;  %2986 = vpow2.f32 %v2713_v12  ;;  %v4451_v56 = vadd.f32 %v4320_v30, %v959_v25  ;;  %v4454_v39 = vadd.f32 %v4320_v30, %v1036_v1 }
 0x225   : > { %v2326_v28 = vsel %vm1056_vm1, %v2121_v43, %v4249_v44  ;;  %v1661_v51 = vmul.f32 %v2981_v46, %v1660_v47  ;;  %v4459_v3 = vadd.f32 1.0, %v2983_v11  ;;  %2988 = vpow2.f32 %v2683_v8 }
 0x226   : > { %2390 = vst [vmem:[%s3293_s15 + $0x1a8] sm:$0xff] %v2326_v28  ;;  %2990 = vpow2.f32 %v2714_v34  ;;  %v2684_v26 = vmul.f32 -1.442695, %v4451_v56  ;;  %v4464_v36 = vadd.f32 %v4320_v30, %v961_v23  ;;  %vm1663_vm2 = vweird.f32 %v4381_v55 }
 0x227   : > { %v1662_v40 = vadd.f32 %v2981_v46, %v1661_v51  ;;  %2992 = vrcp.f32 %v4459_v3  ;;  %vm1665_vm3 = vmor %vm1663_vm2, %vm1664_vm15  ;;  %v1670_v44 = vor.u32 1.1754944e-38, %v1669_v41  ;;  %v2715_v32 = vmul.f32 -1.442695, %v4454_v39  ;;  %v1041_v0 = vpop.f32.mrf.mxu3 }
 0x228   : > { %v2985_v14 = vpop.eup %2984  ;;  %v4471_v60 = vadd.f32 %v4320_v30, %v1039_v52  ;;  %vm1668_vm4 = vcmp.eq.f32.partialorder %v1667_v54, 8.507059e+37  ;;  %v2685_v59 = vmul.f32 -1.442695, %v4464_v36  ;;  %2994 = vpow2.f32 %v2684_v26  ;;  %v964_v35 = vpop.f32.mrf.mxu1 }
 0x229   : > { %v1666_v7 = vsel %vm1665_vm3, %v2981_v46, %v1662_v40  ;;  %v4473_v25 = vadd.f32 1.0, %v2985_v14  ;;  %v2132_v50 = vand.u32 2147483647, %v4459_v3  ;;  %v2134_v49 = vand.u32 2147483648, %v4459_v3 }
 0x22a   : > { %v2987_v48 = vpop.eup %2986  ;;  %v1671_v55 = vsel %vm1668_vm4, %v1670_v44, %v1666_v7  ;;  %v2716_v6 = vmul.f32 -1.442695, %v4471_v60  ;;  %vm2128_vm5 = vweird.f32 %v4459_v3  ;;  %v4514_v8 = vadd.f32 %v4320_v30, %v964_v35 }
 0x22b   : > { %v2989_v31 = vpop.eup %2988  ;;  %v2296_v2 = vsel %vm1056_vm1, %v1671_v55, %v4276_v57  ;;  %2996 = vrcp.f32 %v4473_v25  ;;  %v4483_v53 = vadd.f32 1.0, %v2987_v48  ;;  %v1682_v13 = vand.u32 2147483647, %v4473_v25 }
 0x22c   : > { %v2991_v19 = vpop.eup %2990  ;;  %2360 = vst [vmem:[%s3293_s15 + $0xb8] sm:$0xff] %v2296_v2  ;;  %v4485_v38 = vadd.f32 1.0, %v2989_v31  ;;  %2998 = vpow2.f32 %v2715_v32  ;;  %vm4494_vm6 = vcmp.eq.f32.partialorder %v2132_v50, 8.507059e+37  ;;  %v1684_v16 = vand.u32 2147483648, %v4473_v25 }
 0x22d   : > { %v2993_v1 = vpop.eup %2992  ;;  %v4488_v33 = vadd.f32 1.0, %v2991_v19  ;;  %3000 = vpow2.f32 %v2685_v59  ;;  %v2135_v22 = vor.u32 1.1754944e-38, %v2134_v49  ;;  %vm1678_vm7 = vweird.f32 %v4473_v25 }
 0x22e   : > { %v2124_v57 = vmul.f32 %v2993_v1, %v4459_v3  ;;  %3002 = vrcp.f32 %v4483_v53  ;;  %v2995_v62 = vpop.eup %2994  ;;  %v2147_v61 = vand.u32 2147483647, %v4483_v53  ;;  %v2149_v42 = vand.u32 2147483648, %v4483_v53 }
 0x22f   : > { %3004 = vrcp.f32 %v4485_v38  ;;  %v1699_v15 = vand.u32 2147483648, %v4485_v38  ;;  %vm2129_vm8 = vweird.f32 %v2993_v1  ;;  %vm4506_vm9 = vcmp.eq.f32.partialorder %v1682_v13, 8.507059e+37 }
 0x230   : > { %v2125_v9 = vsub.f32 1.0, %v2124_v57  ;;  %3006 = vpow2.f32 %v2716_v6  ;;  %v1697_v58 = vand.u32 2147483647, %v4485_v38  ;;  %v1685_v24 = vor.u32 1.1754944e-38, %v1684_v16  ;;  %vm4524_vm12 = vmor %vm2128_vm5, %vm2129_vm8  ;;  %v4545_v7 = vpop.f32.mrf.mxu1 }
 0x231   : > { %v2997_v54 = vpop.eup %2996  ;;  %3008 = vrcp.f32 %v4488_v33  ;;  %v4511_v12 = vadd.f32 1.0, %v2995_v62  ;;  %v4517_v23 = vadd.f32 %v4320_v30, %v1041_v0  ;;  %vm2143_vm10 = vweird.f32 %v4483_v53 }
 0x232   : > { %v2999_v4 = vpop.eup %2998  ;;  %v2126_v46 = vmul.f32 %v2993_v1, %v2125_v9  ;;  %v1674_v41 = vmul.f32 %v2997_v54, %v4473_v25  ;;  %vm1693_vm11 = vweird.f32 %v4485_v38  ;;  %vm1679_vm13 = vweird.f32 %v2997_v54 }
 0x233   : > { %v3001_v29 = vpop.eup %3000  ;;  %vm4529_vm14 = vcmp.eq.f32.partialorder %v2147_v61, 8.507059e+37  ;;  %v2150_v51 = vor.u32 1.1754944e-38, %v2149_v42  ;;  %v1700_v52 = vor.u32 1.1754944e-38, %v1699_v15  ;;  %vm4538_vm15 = vcmp.eq.f32.partialorder %v1697_v58, 8.507059e+37  ;;  %vm1680_vm2 = vmor %vm1678_vm7, %vm1679_vm13  ;;  %v4574_v0 = vpop.f32.mrf.mxu3 }
 0x234   : > { %v3003_v27 = vpop.eup %3002  ;;  %v2127_v63 = vadd.f32 %v2993_v1, %v2126_v46  ;;  %v1675_v47 = vsub.f32 1.0, %v1674_v41  ;;  %vm2158_vm0 = vweird.f32 %v4488_v33  ;;  %v4543_v32 = vadd.f32 1.0, %v2999_v4 }
 0x235   : > { %v3005_v34 = vpop.eup %3004  ;;  %v2139_v43 = vmul.f32 %v3003_v27, %v4483_v53  ;;  %v2162_v31 = vand.u32 2147483647, %v4488_v33  ;;  %3010 = vrcp.f32 %v4511_v12  ;;  %vm2144_vm3 = vweird.f32 %v3003_v27 }
 0x236   : > { %v4533_v26 = vpop.eup %3006  ;;  %v2131_v40 = vsel %vm4524_vm12, %v2993_v1, %v2127_v63  ;;  %v1676_v3 = vmul.f32 %v2997_v54, %v1675_v47  ;;  %v1689_v14 = vmul.f32 %v3005_v34, %v4485_v38  ;;  %vm1694_vm4 = vweird.f32 %v3005_v34 }
 0x237   : > { %v3009_v59 = vpop.eup %3008  ;;  %v2136_v48 = vsel %vm4494_vm6, %v2135_v22, %v2131_v40  ;;  %v2140_v55 = vsub.f32 1.0, %v2139_v43  ;;  %v4559_v35 = vadd.f32 1.0, %v3001_v29  ;;  %3012 = vrcp.f32 %v4543_v32  ;;  %vm2145_vm6 = vmor %vm2143_vm10, %vm2144_vm3 }
 0x238   : > { %v2327_v2 = vsel %vm1056_vm1, %v2136_v48, %v4324_v5  ;;  %v1677_v50 = vadd.f32 %v2997_v54, %v1676_v3  ;;  %v1690_v49 = vsub.f32 1.0, %v1689_v14  ;;  %v2154_v19 = vmul.f32 %v3009_v59, %v4488_v33  ;;  %vm1695_vm8 = vmor %vm1693_vm11, %vm1694_vm4 }
 0x239   : > { %2391 = vst [vmem:[%s3293_s15 + $0x1b0] sm:$0xff] %v2327_v2  ;;  %v2141_v6 = vmul.f32 %v3003_v27, %v2140_v55  ;;  %vm4564_vm5 = vcmp.eq.f32.partialorder %v2162_v31, 8.507059e+37  ;;  %v2164_v25 = vand.u32 2147483648, %v4488_v33  ;;  %vm2159_vm7 = vweird.f32 %v3009_v59 }
 0x23a   : > { %v1681_v1 = vsel %vm1680_vm2, %v2997_v54, %v1677_v50  ;;  %v1691_v57 = vmul.f32 %v3005_v34, %v1690_v49  ;;  %v2155_v13 = vsub.f32 1.0, %v2154_v19  ;;  %v1712_v42 = vand.u32 2147483647, %v4511_v12 }
 0x23b   : > { %v1686_v5 = vsel %vm4506_vm9, %v1685_v24, %v1681_v1  ;;  %v2142_v45 = vadd.f32 %v3003_v27, %v2141_v6  ;;  %v3011_v54 = vpop.eup %3010  ;;  %3014 = vrcp.f32 %v4559_v35  ;;  %vm2160_vm9 = vmor %vm2158_vm0, %vm2159_vm7  ;;  %v2165_v18 = vor.u32 1.1754944e-38, %v2164_v25  ;;  %v969_v47 = vpop.f32.mrf.mxu1 }
 0x23c   : > { %v2297_v62 = vsel %vm1056_vm1, %v1686_v5, %v4358_v37  ;;  %v1692_v9 = vadd.f32 %v3005_v34, %v1691_v57  ;;  %v2156_v22 = vmul.f32 %v3009_v59, %v2155_v13  ;;  %v1714_v37 = vand.u32 2147483648, %v4511_v12  ;;  %v1046_v50 = vpop.f32.mrf.mxu3 }
 0x23d   : > { %2361 = vst [vmem:[%s3293_s15 + $0xc0] sm:$0xff] %v2297_v62  ;;  %v2146_v61 = vsel %vm2145_vm6, %v3003_v27, %v2142_v45  ;;  %v1704_v46 = vmul.f32 %v3011_v54, %v4511_v12  ;;  %v2177_v58 = vand.u32 2147483647, %v4543_v32  ;;  %v3013_v29 = vpop.eup %3012  ;;  %vm1708_vm10 = vweird.f32 %v4511_v12 }
 0x23e   : > { %v2151_v53 = vsel %vm4529_vm14, %v2150_v51, %v2146_v61  ;;  %v1696_v15 = vsel %vm1695_vm8, %v3005_v34, %v1692_v9  ;;  %v2157_v4 = vadd.f32 %v3009_v59, %v2156_v22  ;;  %vm4604_vm11 = vcmp.eq.f32.partialorder %v1712_v42, 8.507059e+37 }
 0x23f   : > { %v2328_v41 = vsel %vm1056_vm1, %v2151_v53, %v4425_v17  ;;  %v1701_v38 = vsel %vm4538_vm15, %v1700_v52, %v1696_v15  ;;  %v1705_v63 = vsub.f32 1.0, %v1704_v46  ;;  %v2179_v17 = vand.u32 2147483648, %v4543_v32 }
 0x240   : > { %2392 = vst [vmem:[%s3293_s15 + $0x1b8] sm:$0xff] %v2328_v41  ;;  %v2298_v24 = vsel %vm1056_vm1, %v1701_v38, %v4429_v10  ;;  %v2161_v27 = vsel %vm2160_vm9, %v3009_v59, %v2157_v4  ;;  %v2169_v11 = vmul.f32 %v3013_v29, %v4543_v32  ;;  %vm1709_vm12 = vweird.f32 %v3011_v54 }
 0x241   : > { %2362 = vst [vmem:[%s3293_s15 + $0xc8] sm:$0xff] %v2298_v24  ;;  %v2166_v33 = vsel %vm4564_vm5, %v2165_v18, %v2161_v27  ;;  %v1706_v43 = vmul.f32 %v3011_v54, %v1705_v63  ;;  %v1715_v28 = vor.u32 1.1754944e-38, %v1714_v37  ;;  %v3015_v51 = vpop.eup %3014  ;;  %vm2173_vm13 = vweird.f32 %v4543_v32  ;;  %vm1710_vm15 = vmor %vm1708_vm10, %vm1709_vm12 }
 0x242   : > { %v2329_v10 = vsel %vm1056_vm1, %v2166_v33, %v4433_v21  ;;  %v2170_v52 = vsub.f32 1.0, %v2169_v11  ;;  %v4615_v40 = vadd.f32 1.0, %v4533_v26  ;;  %v2686_v3 = vmul.f32 -1.442695, %v4514_v8 }
 0x243   : > { %2393 = vst [vmem:[%s3293_s15 + $0x1c0] sm:$0xff] %v2329_v10  ;;  %v1707_v14 = vadd.f32 %v3011_v54, %v1706_v43  ;;  %vm4618_vm14 = vcmp.eq.f32.partialorder %v2177_v58, 8.507059e+37  ;;  %v2180_v59 = vor.u32 1.1754944e-38, %v2179_v17  ;;  %v1719_v21 = vmul.f32 %v3015_v51, %v4559_v35  ;;  %v971_v25 = vpop.f32.mrf.mxu1 }
 0x244   : > { %v2171_v48 = vmul.f32 %v3013_v29, %v2170_v52  ;;  %vm2174_vm0 = vweird.f32 %v3013_v29  ;;  %3016 = vrcp.f32 %v4615_v40  ;;  %v4628_v26 = vadd.f32 %v4320_v30, %v4545_v7 }
 0x245   : > { %v1711_v55 = vsel %vm1710_vm15, %v3011_v54, %v1707_v14  ;;  %v1720_v31 = vsub.f32 1.0, %v1719_v21  ;;  %vm1723_vm2 = vweird.f32 %v4559_v35  ;;  %v1729_v2 = vand.u32 2147483648, %v4559_v35  ;;  %vm2175_vm3 = vmor %vm2173_vm13, %vm2174_vm0 }
 0x246   : > { %v1716_v12 = vsel %vm4604_vm11, %v1715_v28, %v1711_v55  ;;  %v2172_v49 = vadd.f32 %v3013_v29, %v2171_v48  ;;  %3018 = vpow2.f32 %v2686_v3  ;;  %v2717_v19 = vmul.f32 -1.442695, %v4517_v23 }
 0x247   : > { %v2299_v6 = vsel %vm1056_vm1, %v1716_v12, %v4451_v56  ;;  %v1721_v7 = vmul.f32 %v3015_v51, %v1720_v31  ;;  %vm1724_vm4 = vweird.f32 %v3015_v51  ;;  %v1727_v1 = vand.u32 2147483647, %v4559_v35 }
 0x248   : > { %2363 = vst [vmem:[%s3293_s15 + $0xd0] sm:$0xff] %v2299_v6  ;;  %v2176_v57 = vsel %vm2175_vm3, %v3013_v29, %v2172_v49  ;;  %3020 = vpow2.f32 %v2717_v19  ;;  %v2687_v13 = vmul.f32 -1.442695, %v4628_v26  ;;  %v4645_v5 = vadd.f32 %v4320_v30, %v4574_v0  ;;  %vm1725_vm5 = vmor %vm1723_vm2, %vm1724_vm4  ;;  %v1049_v29 = vpop.f32.mrf.mxu3 }
 0x249   : > { %v2181_v56 = vsel %vm4618_vm14, %v2180_v59, %v2176_v57  ;;  %v1722_v45 = vadd.f32 %v3015_v51, %v1721_v7  ;;  %v4650_v32 = vadd.f32 %v4320_v30, %v969_v47  ;;  %v4653_v16 = vadd.f32 %v4320_v30, %v1046_v50 }
 0x24a   : > { %v3017_v62 = vpop.eup %3016  ;;  %v2330_v9 = vsel %vm1056_vm1, %v2181_v56, %v4454_v39  ;;  %v1730_v22 = vor.u32 1.1754944e-38, %v1729_v2  ;;  %3022 = vpow2.f32 %v2687_v13  ;;  %v2718_v0 = vmul.f32 -1.442695, %v4645_v5 }
 0x24b   : > { %2394 = vst [vmem:[%s3293_s15 + $0x1c8] sm:$0xff] %v2330_v9  ;;  %v1726_v54 = vsel %vm1725_vm5, %v3015_v51, %v1722_v45  ;;  %vm1728_vm6 = vcmp.eq.f32.partialorder %v1727_v1, 8.507059e+37  ;;  %v2184_v61 = vmul.f32 %v3017_v62, %v4615_v40  ;;  %v2688_v42 = vmul.f32 -1.442695, %v4650_v32 }
 0x24c   : > { %v3019_v37 = vpop.eup %3018  ;;  %v1731_v53 = vsel %vm1728_vm6, %v1730_v22, %v1726_v54  ;;  %3024 = vpow2.f32 %v2718_v0  ;;  %v2719_v39 = vmul.f32 -1.442695, %v4653_v16  ;;  %v4666_v35 = vadd.f32 %v4320_v30, %v971_v25 }
 0x24d   : > { %v2300_v15 = vsel %vm1056_vm1, %v1731_v53, %v4464_v36  ;;  %v2185_v4 = vsub.f32 1.0, %v2184_v61  ;;  %v4671_v46 = vadd.f32 1.0, %v3019_v37  ;;  %3026 = vpow2.f32 %v2688_v42 }
 0x24e   : > { %v3021_v41 = vpop.eup %3020  ;;  %2364 = vst [vmem:[%s3293_s15 + $0xd8] sm:$0xff] %v2300_v15  ;;  %v2192_v38 = vand.u32 2147483647, %v4615_v40  ;;  %v2194_v18 = vand.u32 2147483648, %v4615_v40  ;;  %vm2189_vm7 = vweird.f32 %v3017_v62  ;;  %v2689_v36 = vmul.f32 -1.442695, %v4666_v35 }
 0x24f   : > { %v2186_v58 = vmul.f32 %v3017_v62, %v2185_v4  ;;  %3028 = vrcp.f32 %v4671_v46  ;;  %v4677_v27 = vadd.f32 1.0, %v3021_v41  ;;  %vm2188_vm8 = vweird.f32 %v4615_v40 }
 0x250   : > { %v3023_v24 = vpop.eup %3022  ;;  %3030 = vpow2.f32 %v2719_v39  ;;  %vm2190_vm9 = vmor %vm2188_vm8, %vm2189_vm7  ;;  %vm2193_vm10 = vcmp.eq.f32.partialorder %v2192_v38, 8.507059e+37  ;;  %v2195_v33 = vor.u32 1.1754944e-38, %v2194_v18  ;;  %v4685_v34 = vadd.f32 %v4320_v30, %v1049_v29  ;;  %v1051_v18 = vpop.f32.mrf.mxu3 }
 0x251   : > { %v2187_v63 = vadd.f32 %v3017_v62, %v2186_v58  ;;  %v4681_v17 = vadd.f32 1.0, %v3023_v24  ;;  %3032 = vrcp.f32 %v4677_v27  ;;  %v1742_v43 = vand.u32 2147483647, %v4671_v46 }
 0x252   : > { %v3025_v47 = vpop.eup %3024  ;;  %v1744_v28 = vand.u32 2147483648, %v4671_v46  ;;  %v2207_v52 = vand.u32 2147483647, %v4677_v27  ;;  %v2209_v14 = vand.u32 2147483648, %v4677_v27  ;;  %vm1738_vm11 = vweird.f32 %v4671_v46 }
 0x253   : > { %v3027_v11 = vpop.eup %3026  ;;  %v2191_v10 = vsel %vm2190_vm9, %v3017_v62, %v2187_v63  ;;  %3034 = vrcp.f32 %v4681_v17  ;;  %v4695_v44 = vadd.f32 1.0, %v3025_v47  ;;  %v1757_v48 = vand.u32 2147483647, %v4681_v17 }
 0x254   : > { %v2196_v51 = vsel %vm2193_vm10, %v2195_v33, %v2191_v10  ;;  %3036 = vpow2.f32 %v2689_v36  ;;  %v4697_v59 = vadd.f32 1.0, %v3027_v11  ;;  %v1759_v55 = vand.u32 2147483648, %v4681_v17 }
 0x255   : > { %v3029_v40 = vpop.eup %3028  ;;  %v2331_v3 = vsel %vm1056_vm1, %v2196_v51, %v4471_v60  ;;  %vm4704_vm12 = vcmp.eq.f32.partialorder %v1742_v43, 8.507059e+37  ;;  %v1745_v60 = vor.u32 1.1754944e-38, %v1744_v28  ;;  %3038 = vrcp.f32 %v4695_v44 }
 0x256   : > { %2395 = vst [vmem:[%s3293_s15 + $0x1d0] sm:$0xff] %v2331_v3  ;;  %v1734_v21 = vmul.f32 %v3029_v40, %v4671_v46  ;;  %v3031_v31 = vpop.eup %3030  ;;  %v2720_v50 = vmul.f32 -1.442695, %v4685_v34  ;;  %vm2203_vm13 = vweird.f32 %v4677_v27  ;;  %vm1753_vm14 = vweird.f32 %v4681_v17 }
 0x257   : > { %v3033_v12 = vpop.eup %3032  ;;  %3040 = vrcp.f32 %v4697_v59  ;;  %vm1739_vm15 = vweird.f32 %v3029_v40  ;;  %vm4714_vm0 = vcmp.eq.f32.partialorder %v2207_v52, 8.507059e+37  ;;  %v2210_v1 = vor.u32 1.1754944e-38, %v2209_v14 }
 0x258   : > { %v1735_v49 = vsub.f32 1.0, %v1734_v21  ;;  %v2199_v6 = vmul.f32 %v3033_v12, %v4677_v27  ;;  %vm4719_vm2 = vcmp.eq.f32.partialorder %v1757_v48, 8.507059e+37  ;;  %v1760_v25 = vor.u32 1.1754944e-38, %v1759_v55  ;;  %vm1740_vm4 = vmor %vm1738_vm11, %vm1739_vm15 }
 0x259   : > { %v3035_v19 = vpop.eup %3034  ;;  %v2222_v9 = vand.u32 2147483647, %v4695_v44  ;;  %v2224_v22 = vand.u32 2147483648, %v4695_v44  ;;  %v4725_v0 = vadd.f32 1.0, %v3031_v31  ;;  %vm2218_vm3 = vweird.f32 %v4695_v44 }
 0x25a   : > { %v3037_v57 = vpop.eup %3036  ;;  %v1736_v13 = vmul.f32 %v3029_v40, %v1735_v49  ;;  %v1749_v56 = vmul.f32 %v3035_v19, %v4681_v17  ;;  %v2200_v62 = vsub.f32 1.0, %v2199_v6  ;;  %v1772_v42 = vand.u32 2147483647, %v4697_v59 }
 0x25b   : > { %3042 = vpow2.f32 %v2720_v50  ;;  %v3039_v37 = vpop.eup %3038  ;;  %vm2204_vm5 = vweird.f32 %v3033_v12  ;;  %vm1768_vm6 = vweird.f32 %v4697_v59  ;;  %v4734_v39 = vadd.f32 1.0, %v3037_v57 }
 0x25c   : > { %v1737_v54 = vadd.f32 %v3029_v40, %v1736_v13  ;;  %v1750_v61 = vsub.f32 1.0, %v1749_v56  ;;  %v2201_v53 = vmul.f32 %v3033_v12, %v2200_v62  ;;  %3044 = vrcp.f32 %v4725_v0  ;;  %vm2205_vm9 = vmor %vm2203_vm13, %vm2204_vm5 }
 0x25d   : > { %v3041_v15 = vpop.eup %3040  ;;  %vm1754_vm7 = vweird.f32 %v3035_v19  ;;  %v2214_v38 = vmul.f32 %v3039_v37, %v4695_v44  ;;  %vm4739_vm8 = vcmp.eq.f32.partialorder %v2222_v9, 8.507059e+37  ;;  %v1774_v33 = vand.u32 2147483648, %v4697_v59 }
 0x25e   : > { %v1741_v4 = vsel %vm1740_vm4, %v3029_v40, %v1737_v54  ;;  %v1751_v41 = vmul.f32 %v3035_v19, %v1750_v61  ;;  %v2202_v58 = vadd.f32 %v3033_v12, %v2201_v53  ;;  %v1764_v24 = vmul.f32 %v3041_v15, %v4697_v59  ;;  %vm1755_vm10 = vmor %vm1753_vm14, %vm1754_vm7 }
 0x25f   : > { %v1746_v46 = vsel %vm4704_vm12, %v1745_v60, %v1741_v4  ;;  %v2215_v47 = vsub.f32 1.0, %v2214_v38  ;;  %3046 = vrcp.f32 %v4734_v39  ;;  %v4756_v43 = vadd.f32 %v4320_v30, %v1051_v18 }
 0x260   : > { %v2301_v36 = vsel %vm1056_vm1, %v1746_v46, %v4514_v8  ;;  %v1752_v63 = vadd.f32 %v3035_v19, %v1751_v41  ;;  %v2206_v11 = vsel %vm2205_vm9, %v3033_v12, %v2202_v58  ;;  %v1765_v10 = vsub.f32 1.0, %v1764_v24 }
 0x261   : > { %2365 = vst [vmem:[%s3293_s15 + $0xe0] sm:$0xff] %v2301_v36  ;;  %v3043_v8 = vpop.eup %3042  ;;  %v2211_v27 = vsel %vm4714_vm0, %v2210_v1, %v2206_v11  ;;  %v2216_v51 = vmul.f32 %v3039_v37, %v2215_v47  ;;  %vm2219_vm11 = vweird.f32 %v3039_v37  ;;  %vm1769_vm12 = vweird.f32 %v3041_v15 }
 0x262   : > { %v1756_v28 = vsel %vm1755_vm10, %v3035_v19, %v1752_v63  ;;  %v3045_v52 = vpop.eup %3044  ;;  %v2332_v17 = vsel %vm1056_vm1, %v2211_v27, %v4517_v23  ;;  %v1766_v3 = vmul.f32 %v3041_v15, %v1765_v10  ;;  %v2225_v21 = vor.u32 1.1754944e-38, %v2224_v22  ;;  %vm2220_vm13 = vmor %vm2218_vm3, %vm2219_vm11 }
 0x263   : > { %v1761_v40 = vsel %vm4719_vm2, %v1760_v25, %v1756_v28  ;;  %2396 = vst [vmem:[%s3293_s15 + $0x1d8] sm:$0xff] %v2332_v17  ;;  %v2217_v14 = vadd.f32 %v3039_v37, %v2216_v51  ;;  %v2229_v48 = vmul.f32 %v3045_v52, %v4725_v0  ;;  %vm1773_vm14 = vcmp.eq.f32.partialorder %v1772_v42, 8.507059e+37  ;;  %vm1770_vm15 = vmor %vm1768_vm6, %vm1769_vm12 }
 0x264   : > { %v2302_v30 = vsel %vm1056_vm1, %v1761_v40, %v4628_v26  ;;  %v1767_v55 = vadd.f32 %v3041_v15, %v1766_v3  ;;  %v1775_v23 = vor.u32 1.1754944e-38, %v1774_v33  ;;  %v2237_v31 = vand.u32 2147483647, %v4725_v0 }
 0x265   : > { %2366 = vst [vmem:[%s3293_s15 + $0xe8] sm:$0xff] %v2302_v30  ;;  %v2221_v2 = vsel %vm2220_vm13, %v3039_v37, %v2217_v14  ;;  %v2230_v26 = vsub.f32 1.0, %v2229_v48  ;;  %v2239_v60 = vand.u32 2147483648, %v4725_v0  ;;  %v1311_v50 = vadd.f32 1.0, %v3043_v8  ;;  %v3047_v12 = vpop.eup %3046 }
 0x266   : > { %v2226_v44 = vsel %vm4739_vm8, %v2225_v21, %v2221_v2  ;;  %v1771_v49 = vsel %vm1770_vm15, %v3041_v15, %v1767_v55  ;;  %vm2234_vm0 = vweird.f32 %v3045_v52  ;;  %v2721_v19 = vmul.f32 -1.442695, %v4756_v43 }
 0x267   : > { %v2333_v6 = vsel %vm1056_vm1, %v2226_v44, %v4645_v5  ;;  %v1776_v7 = vsel %vm1773_vm14, %v1775_v23, %v1771_v49  ;;  %v2231_v59 = vmul.f32 %v3045_v52, %v2230_v26  ;;  %v1779_v1 = vmul.f32 %v3047_v12, %v4734_v39 }
 0x268   : > { %2397 = vst [vmem:[%s3293_s15 + $0x1e0] sm:$0xff] %v2333_v6  ;;  %v2303_v57 = vsel %vm1056_vm1, %v1776_v7, %v4650_v32  ;;  %3048 = vrcp.f32 %v1311_v50  ;;  %vm2233_vm2 = vweird.f32 %v4725_v0  ;;  %vm2238_vm4 = vcmp.eq.f32.partialorder %v2237_v31, 8.507059e+37 }
 0x269   : > { %2367 = vst [vmem:[%s3293_s15 + $0xf0] sm:$0xff] %v2303_v57  ;;  %v2232_v13 = vadd.f32 %v3045_v52, %v2231_v59  ;;  %v1780_v56 = vsub.f32 1.0, %v1779_v1  ;;  %vm2235_vm3 = vmor %vm2233_vm2, %vm2234_vm0  ;;  %v2240_v45 = vor.u32 1.1754944e-38, %v2239_v60  ;;  %v1789_v5 = vand.u32 2147483648, %v4734_v39 }
 0x26a   : > { %3050 = vpow2.f32 %v2721_v19  ;;  %vm1784_vm5 = vweird.f32 %v3047_v12  ;;  %v1787_v9 = vand.u32 2147483647, %v4734_v39  ;;  %vm1783_vm6 = vweird.f32 %v4734_v39 }
 0x26b   : > { %v2236_v25 = vsel %vm2235_vm3, %v3045_v52, %v2232_v13  ;;  %v1781_v62 = vmul.f32 %v3047_v12, %v1780_v56  ;;  %vm1785_vm7 = vmor %vm1783_vm6, %vm1784_vm5  ;;  %v1790_v61 = vor.u32 1.1754944e-38, %v1789_v5  ;;  %v2252_v39 = vand.u32 2147483647, %v1311_v50 }
 0x26c   : > { %v2241_v22 = vsel %vm2238_vm4, %v2240_v45, %v2236_v25  ;;  %vm1788_vm8 = vcmp.eq.f32.partialorder %v1787_v9, 8.507059e+37  ;;  %vm2248_vm10 = vweird.f32 %v1311_v50 }
 0x26d   : > { %v2334_v32 = vsel %vm1056_vm1, %v2241_v22, %v4653_v16  ;;  %v1782_v0 = vadd.f32 %v3047_v12, %v1781_v62  ;;  %v2254_v16 = vand.u32 2147483648, %v1311_v50  ;;  %vm2253_vm12 = vcmp.eq.f32.partialorder %v2252_v39, 8.507059e+37 }
 0x26e   : > { %v3049_v54 = vpop.eup %3048  ;;  %2398 = vst [vmem:[%s3293_s15 + $0x1e8] sm:$0xff] %v2334_v32 }
 0x26f   : > { %v1786_v42 = vsel %vm1785_vm7, %v3047_v12, %v1782_v0  ;;  %v2244_v37 = vmul.f32 %v3049_v54, %v1311_v50  ;;  %vm2249_vm9 = vweird.f32 %v3049_v54  ;;  %v2255_v58 = vor.u32 1.1754944e-38, %v2254_v16 }
 0x270   : > { %v3051_v53 = vpop.eup %3050  ;;  %v1791_v15 = vsel %vm1788_vm8, %v1790_v61, %v1786_v42  ;;  %vm2250_vm11 = vmor %vm2248_vm10, %vm2249_vm9 }
 0x271   : > { %v2304_v4 = vsel %vm1056_vm1, %v1791_v15, %v4666_v35  ;;  %v2245_v41 = vsub.f32 1.0, %v2244_v37  ;;  %v1312_v38 = vadd.f32 1.0, %v3051_v53 }
 0x272   : > { %2368 = vst [vmem:[%s3293_s15 + $0xf8] sm:$0xff] %v2304_v4 }
 0x273   : > { %v2246_v18 = vmul.f32 %v3049_v54, %v2245_v41  ;;  %3052 = vrcp.f32 %v1312_v38  ;;  %v2269_v33 = vand.u32 2147483648, %v1312_v38  ;;  %v2267_v10 = vand.u32 2147483647, %v1312_v38 }
 0x274   : > { %vm2263_vm14 = vweird.f32 %v1312_v38 }
 0x275   : > { %v2247_v46 = vadd.f32 %v3049_v54, %v2246_v18  ;;  %v2270_v27 = vor.u32 1.1754944e-38, %v2269_v33  ;;  %vm2268_vm0 = vcmp.eq.f32.partialorder %v2267_v10, 8.507059e+37 }
 0x277   : > { %v2251_v29 = vsel %vm2250_vm11, %v3049_v54, %v2247_v46 }
 0x278   : > { %v2256_v24 = vsel %vm2253_vm12, %v2255_v58, %v2251_v29 }
 0x279   : > { %v3053_v36 = vpop.eup %3052  ;;  %v2335_v35 = vsel %vm1056_vm1, %v2256_v24, %v4685_v34 }
 0x27a   : > { %2399 = vst [vmem:[%s3293_s15 + $0x1f0] sm:$0xff] %v2335_v35  ;;  %v2259_v63 = vmul.f32 %v3053_v36, %v1312_v38  ;;  %vm2264_vm13 = vweird.f32 %v3053_v36 }
 0x27b   : > { %vm2265_vm15 = vmor %vm2263_vm14, %vm2264_vm13 }
 0x27c   : > { %v2260_v47 = vsub.f32 1.0, %v2259_v63 }
 0x27e   : > { %v2261_v11 = vmul.f32 %v3053_v36, %v2260_v47 }
 0x280   : > { %v2262_v8 = vadd.f32 %v3053_v36, %v2261_v11 }
 0x282   : > { %v2266_v28 = vsel %vm2265_vm15, %v3053_v36, %v2262_v8 }
 0x283   : > { %v2271_v51 = vsel %vm2268_vm0, %v2270_v27, %v2266_v28 }
 0x284   : > { %v2336_v52 = vsel %vm1056_vm1, %v2271_v51, %v4756_v43 }
 0x285   : > { %2400 = vst [vmem:[%s3293_s15 + $0x1f8] sm:$0xff] %v2336_v52 }
 0x286 PF: > { %s15_s18 = sadd.s32 1, %s3063_s18  }
 0x287   : > { %p12_p4 = scmp.ge.s32.totalorder %s15_s18, 6  }
 0x289   :  { %14 = sbr.rel (!%p12_p4) target bundleno = 1 (0x1), region = 70 }

</bundles_post_ra>
